<compile_context>
chip_gen: v6e
topology: v6e:2x2x1
jax: 0.10.0
libtpu: 0.0.40
codegen_flags: <defaults>
</compile_context>

<pallas_src>
import math

import jax
import jax.numpy as jnp
import numpy as np
from jax import lax
from jax.experimental import pallas as pl
from jax.experimental.pallas import tpu as pltpu


# ---------------------------------------------------------------------------
# Small static helpers (trace-time Python).
# ---------------------------------------------------------------------------
def _pick_unroll(n):
    if n <= 0:
        return 1
    if n <= 8:
        return n
    for u in (8, 4, 2):
        if n % u == 0:
            return u
    return 1


def _choose_batch_block(batch):
    # Split the batch across TensorCores (v7x megacore) when it stays
    # sublane-aligned; single block otherwise (no effect on v5e/v6e).
    if batch % 16 == 0:
        return batch // 2
    return batch


def _choose_chunk_len(seq_len, batch_block, hidden_dim, num_layers,
                      stream_itemsize, vmem_budget_bytes):
    """Largest time-chunk whose double-buffered g0 stream + resident weights +
    state scratch fit the VMEM budget; prefer a divisor of seq_len (no pad)."""
    H = hidden_dim
    resident = (H * 4 * H + (num_layers - 1) * (2 * H * 4 * H + 4 * H)) * stream_itemsize
    state = 2 * num_layers * batch_block * H * 4
    headroom = 2 * 1024 * 1024
    avail = max(vmem_budget_bytes - resident - state - headroom, 1 * 1024 * 1024)
    per_step = 2 * batch_block * 4 * H * stream_itemsize      # double-buffered g0 rows
    tc = max(int(avail // per_step), 1)
    tc = min(tc, seq_len, 512)
    # Prefer a divisor of seq_len so we never jnp.pad the pre-activations.
    for d in range(tc, 0, -1):
        if seq_len % d == 0:
            if 2 * d >= tc:                                    # not pathologically small
                return d
            break
    return tc


# ---------------------------------------------------------------------------
# Fused multi-layer LSTM recurrence kernel (grid: (batch blocks, time chunks)).
# ---------------------------------------------------------------------------
def _make_fused_lstm_kernel(num_layers, hidden_dim, batch_block, chunk_len,
                            seq_len, num_chunks):
    H = hidden_dim
    Bb = batch_block
    Tc = chunk_len
    last = num_chunks - 1
    rem = seq_len - last * Tc                 # valid steps in the final chunk
    full_unroll = _pick_unroll(Tc)
    tail_unroll = _pick_unroll(rem)

    def kernel(*refs):
        # refs: g0, whh0, (wih_l, whh_l, b_l) for l=1..L-1,
        #       h_out, c_out, h_sc[0..L-1], c_sc[0..L-1]
        idx = 0
        g0_ref = refs[idx]; idx += 1
        whh = [refs[idx]]; idx += 1
        wih = [None]
        bias = [None]
        for _ in range(1, num_layers):
            wih.append(refs[idx]); whh.append(refs[idx + 1]); bias.append(refs[idx + 2])
            idx += 3
        h_out_ref = refs[idx]; c_out_ref = refs[idx + 1]; idx += 2
        h_sc = list(refs[idx: idx + num_layers]); idx += num_layers
        c_sc = list(refs[idx: idx + num_layers]); idx += num_layers

        chunk = pl.program_id(1)

        @pl.when(chunk == 0)
        def _():
            for l in range(num_layers):
                h_sc[l][...] = jnp.zeros_like(h_sc[l])
                c_sc[l][...] = jnp.zeros_like(c_sc[l])

        # Hoisted per-chunk weight loads / casts (weights may stream bf16; all
        # gate math stays f32) and bias broadcast (JAX does not CSE it).
        whh_f = [whh[l][...].astype(jnp.float32) for l in range(num_layers)]
        wih_f = [None] + [wih[l][...].astype(jnp.float32) for l in range(1, num_layers)]
        b_full = [None] + [
            jnp.broadcast_to(bias[l][...].astype(jnp.float32), (Bb, 4 * H))
            for l in range(1, num_layers)
        ]

        def cell(gates, c_prev):
            # gates packed [i, f, o | g]: one wide sigmoid + one tanh.
            sig = jax.nn.sigmoid(gates[:, : 3 * H])
            g = jnp.tanh(gates[:, 3 * H:])
            i = sig[:, 0 * H:1 * H]
            f = sig[:, 1 * H:2 * H]
            o = sig[:, 2 * H:3 * H]
            c_new = f * c_prev + i * g
            h_new = o * jnp.tanh(c_new)
            return h_new, c_new

        def step(tt, carry):
            x = None
            for l in range(num_layers):
                if l == 0:
                    # Input projection precomputed outside; only the recurrent
                    # (Bb, H) x (H, 4H) matmul sits on the serial critical path.
                    gates = g0_ref[tt].astype(jnp.float32) + jnp.dot(
                        h_sc[0][...], whh_f[0], preferred_element_type=jnp.float32)
                else:
                    gates = (jnp.dot(x, wih_f[l], preferred_element_type=jnp.float32)
                             + jnp.dot(h_sc[l][...], whh_f[l],
                                       preferred_element_type=jnp.float32)
                             + b_full[l])
                h_new, c_new = cell(gates, c_sc[l][...])
                h_sc[l][...] = h_new
                c_sc[l][...] = c_new
                x = h_new
            return carry

        if rem == Tc:
            # All chunks full: one static, unrolled loop (LLO-visible).
            lax.fori_loop(0, Tc, step, 0, unroll=full_unroll)
        else:
            # Ragged tail: bounded static trip count, no per-step masking.
            @pl.when(chunk != last)
            def _():
                lax.fori_loop(0, Tc, step, 0, unroll=full_unroll)

            @pl.when(chunk == last)
            def _():
                lax.fori_loop(0, rem, step, 0, unroll=tail_unroll)

        # Output blocks are VMEM-resident across chunks; write only once.
        @pl.when(chunk == last)
        def _():
            for l in range(num_layers):
                h_out_ref[l] = h_sc[l][...].astype(h_out_ref.dtype)
                c_out_ref[l] = c_sc[l][...].astype(c_out_ref.dtype)

    return kernel


def _fused_lstm(g0, layer_params, seq_len, chunk_len, batch_block, vmem_limit_bytes):
    """g0: (T_pad, B, 4H) layer-0 gate pre-activations (time-major)."""
    T_pad, B, G = g0.shape
    H = G // 4
    L = len(layer_params)
    Tc = chunk_len
    num_chunks = T_pad // Tc
    Bb = batch_block
    nb = B // Bb

    def resident(shape):
        # Constant index_map -> VMEM-resident; single buffer saves VMEM.
        return pl.BlockSpec(shape, lambda b, c: (0,) * len(shape),
                            pipeline_mode=pl.Buffered(1))

    in_specs = [
        pl.BlockSpec((Tc, Bb, 4 * H), lambda b, c: (c, b, 0)),   # streamed pre-activations
        resident((H, 4 * H)),                                    # W_hh layer 0
    ]
    args = [g0, layer_params[0]["whh"]]
    for lp in layer_params[1:]:
        in_specs += [resident((H, 4 * H)),                       # W_ih layer l
                     resident((H, 4 * H)),                       # W_hh layer l
                     resident((1, 4 * H))]                       # bias layer l
        args += [lp["wih"], lp["whh"], lp["b"]]

    out_shape = (jax.ShapeDtypeStruct((L, B, H), jnp.float32),   # final hidden
                 jax.ShapeDtypeStruct((L, B, H), jnp.float32))   # final cell
    out_specs = (pl.BlockSpec((L, Bb, H), lambda b, c: (0, b, 0)),
                 pl.BlockSpec((L, Bb, H), lambda b, c: (0, b, 0)))
    scratch = [pltpu.VMEM((Bb, H), jnp.float32) for _ in range(2 * L)]

    kernel = _make_fused_lstm_kernel(L, H, Bb, Tc, seq_len, num_chunks)
    return pl.pallas_call(
        kernel,
        out_shape=out_shape,
        grid_spec=pltpu.PrefetchScalarGridSpec(
            num_scalar_prefetch=0,
            grid=(nb, num_chunks),
            in_specs=in_specs,
            out_specs=out_specs,
            scratch_shapes=scratch,
        ),
        compiler_params=pltpu.CompilerParams(
            # batch axis shards across TensorCores (v7x); time carries state.
            dimension_semantics=("parallel", "arbitrary"),
            vmem_limit_bytes=int(vmem_limit_bytes),
        ),
    )(*args)


# ---------------------------------------------------------------------------
# Encoder forward: embedding gather + hoisted input projection (glue) +
# fused Pallas LSTM recurrence.
# ---------------------------------------------------------------------------
def encoder_forward(src, params, *, chunk_len=None, stream_dtype=None,
                    vmem_budget_bytes=32 * 1024 * 1024):
    emb = jnp.take(params["embedding"], src, axis=0)              # (B, T, E) glue gather
    B, T, E = emb.shape
    l0 = params["lstm"][0]
    H = l0["whh"].shape[0]
    L = len(params["lstm"])

    # Hoisted layer-0 input projection: one big lane-dense matmul over all
    # timesteps, written time-major directly (no separate transpose pass).
    g0 = jnp.einsum("bte,eg->tbg", emb, l0["wih"],
                    preferred_element_type=jnp.float32) + l0["b"]  # (T, B, 4H)
    if stream_dtype is not None:
        # Production: stream_dtype=jnp.bfloat16 halves HBM traffic of the
        # dominant (T,B,4H) tensor and weight VMEM; gate math stays f32.
        g0 = g0.astype(stream_dtype)

    bb = _choose_batch_block(B)
    itemsize = jnp.dtype(g0.dtype).itemsize
    if chunk_len is None:
        chunk_len = _choose_chunk_len(T, bb, H, L, itemsize, vmem_budget_bytes)
    chunk_len = max(1, min(chunk_len, T))

    T_pad = ((T + chunk_len - 1) // chunk_len) * chunk_len
    if T_pad != T:
        # Only hit when no reasonable divisor of T exists; padded tail steps
        # are skipped inside the kernel (bounded trip count), never computed.
        g0 = jnp.pad(g0, ((0, T_pad - T), (0, 0), (0, 0)))

    lstm_params = params["lstm"]
    if stream_dtype is not None:
        lstm_params = [{k: v.astype(stream_dtype) for k, v in lp.items()}
                       for lp in lstm_params]

    hidden, cell = _fused_lstm(g0, lstm_params, T, chunk_len, bb, vmem_budget_bytes)
    return hidden, cell                                            # (L, B, H) each


# ---------------------------------------------------------------------------
# Deterministic parameter init (PyTorch-style uniform(-1/sqrt(H), 1/sqrt(H))),
# repacked for the fused kernel: gate order [i, f, o, g] (from PyTorch
# [i, f, g, o]), W_ih (in_dim, 4H), W_hh (H, 4H), b (1, 4H) = b_ih + b_hh.
# ---------------------------------------------------------------------------
def _repack_gates(w):
    """(4H, ...) rows in PyTorch order [i,f,g,o] -> packed order [i,f,o,g]."""
    H = w.shape[0] // 4
    return jnp.concatenate([w[: 2 * H], w[3 * H:], w[2 * H: 3 * H]], axis=0)


def init_params(key, vocab_size, embed_dim, hidden_dim, num_layers):
    keys = jax.random.split(key, 1 + 4 * num_layers)
    emb = jax.random.normal(keys[0], (vocab_size, embed_dim), jnp.float32) * 0.1
    emb = emb.at[0].set(0.0)  # padding_idx=0
    k = 1.0 / math.sqrt(hidden_dim)
    layers = []
    for l in range(num_layers):
        in_dim = embed_dim if l == 0 else hidden_dim
        kw = keys[1 + 4 * l: 1 + 4 * (l + 1)]
        # PyTorch layout: weight_ih_l{k} is (4H, in_dim), gates [i,f,g,o] on dim 0.
        w_ih = jax.random.uniform(kw[0], (4 * hidden_dim, in_dim), jnp.float32, -k, k)
        w_hh = jax.random.uniform(kw[1], (4 * hidden_dim, hidden_dim), jnp.float32, -k, k)
        b_ih = jax.random.uniform(kw[2], (4 * hidden_dim,), jnp.float32, -k, k)
        b_hh = jax.random.uniform(kw[3], (4 * hidden_dim,), jnp.float32, -k, k)
        layers.append({
            "wih": jnp.transpose(_repack_gates(w_ih)),          # (in_dim, 4H)
            "whh": jnp.transpose(_repack_gates(w_hh)),          # (H, 4H)
            "b": _repack_gates((b_ih + b_hh)[:, None])[:, 0][None, :],   # (1, 4H)
        })
    return {"embedding": emb, "lstm": layers}


# ---------------------------------------------------------------------------
# Pure-JAX reference (same math, packed gate order [i,f,o,g]) for correctness.
# ---------------------------------------------------------------------------
def _lstm_layer_ref(x_tbd, wih, whh, b):
    H = whh.shape[0]
    B = x_tbd.shape[1]

    def step(carry, x_t):
        h, c = carry
        gates = x_t @ wih + h @ whh + b
        i = jax.nn.sigmoid(gates[:, :H])
        f = jax.nn.sigmoid(gates[:, H:2 * H])
        o = jax.nn.sigmoid(gates[:, 2 * H:3 * H])
        g = jnp.tanh(gates[:, 3 * H:])
        c = f * c + i * g
        h = o * jnp.tanh(c)
        return (h, c), h

    init = (jnp.zeros((B, H), jnp.float32), jnp.zeros((B, H), jnp.float32))
    (h, c), outs = lax.scan(step, init, x_tbd)
    return outs, h, c


def encoder_ref(src, params):
    emb = jnp.take(params["embedding"], src, axis=0)
    x = jnp.transpose(emb, (1, 0, 2))
    hs, cs = [], []
    for layer in params["lstm"]:
        x, h, c = _lstm_layer_ref(x, layer["wih"], layer["whh"], layer["b"])
        hs.append(h)
        cs.append(c)
    return jnp.stack(hs, 0), jnp.stack(cs, 0)


if __name__ == "__main__":
    VOCAB, EMBED, HIDDEN, LAYERS = 16, 32, 32, 2
    B, T = 2, 8

    key = jax.random.PRNGKey(0)
    kp, ks = jax.random.split(key)
    params = init_params(kp, VOCAB, EMBED, HIDDEN, LAYERS)
    src = jax.random.randint(ks, (B, T), 0, VOCAB, dtype=jnp.int32)

    fwd = jax.jit(encoder_forward)           # f32 streaming for the tight check;
    hidden, cell = fwd(src, params)          # pass stream_dtype=jnp.bfloat16 in prod.
    hidden, cell = jax.block_until_ready((hidden, cell))

    h_ref, c_ref = encoder_ref(src, params)
    np.testing.assert_allclose(np.asarray(hidden), np.asarray(h_ref), rtol=1e-3, atol=1e-3)
    np.testing.assert_allclose(np.asarray(cell), np.asarray(c_ref), rtol=1e-3, atol=1e-3)

    assert hidden.shape == (LAYERS, B, HIDDEN) and cell.shape == (LAYERS, B, HIDDEN)
    print("KERNEL_OK")
</pallas_src>

<mosaic_0001>
module attributes {stable_mosaic.version = 11 : i64} {
  func.func @kernel(%arg0: i32, %arg1: i32, %arg2: memref<8x2x128xf32, #tpu.memory_space<vmem>>, %arg3: memref<32x128xf32, #tpu.memory_space<vmem>>, %arg4: memref<32x128xf32, #tpu.memory_space<vmem>>, %arg5: memref<32x128xf32, #tpu.memory_space<vmem>>, %arg6: memref<1x128xf32, #tpu.memory_space<vmem>>, %arg7: memref<2x2x32xf32, #tpu.memory_space<vmem>>, %arg8: memref<2x2x32xf32, #tpu.memory_space<vmem>>, %arg9: memref<2x32xf32, #tpu.memory_space<vmem>>, %arg10: memref<2x32xf32, #tpu.memory_space<vmem>>, %arg11: memref<2x32xf32, #tpu.memory_space<vmem>>, %arg12: memref<2x32xf32, #tpu.memory_space<vmem>>) attributes {dimension_semantics = [#tpu.dimension_semantics<parallel>, #tpu.dimension_semantics<arbitrary>], iteration_bounds = array<i64: 1, 1>, scalar_prefetch = 0 : i64, scratch_operands = 4 : i64, tpu.core_type = #tpu.core_type<tc>, window_params = [{transform_indices = @transform_0, window_bounds = array<i64: 8, 2, 128>}, {pipeline_mode = #tpu.pipeline_mode<synchronous>, transform_indices = @transform_1, window_bounds = array<i64: 32, 128>}, {pipeline_mode = #tpu.pipeline_mode<synchronous>, transform_indices = @transform_2, window_bounds = array<i64: 32, 128>}, {pipeline_mode = #tpu.pipeline_mode<synchronous>, transform_indices = @transform_3, window_bounds = array<i64: 32, 128>}, {pipeline_mode = #tpu.pipeline_mode<synchronous>, transform_indices = @transform_4, window_bounds = array<i64: 1, 128>}, {transform_indices = @transform_5, window_bounds = array<i64: 2, 2, 32>}, {transform_indices = @transform_6, window_bounds = array<i64: 2, 2, 32>}]} {
    %c0_i32 = arith.constant 0 : i32
    %0 = arith.cmpi eq, %arg1, %c0_i32 : i32
    %1 = arith.extui %0 : i1 to i32
    %c0_i32_0 = arith.constant 0 : i32
    %2 = arith.cmpi ne, %1, %c0_i32_0 : i32
    scf.if %2 {
      %cst_194 = arith.constant 0.000000e+00 : f32
      %404 = vector.broadcast %cst_194 : f32 to vector<2x32xf32>
      %c0_195 = arith.constant 0 : index
      %c0_196 = arith.constant 0 : index
      %405 = vector.load %arg9[%c0_195, %c0_196] : memref<2x32xf32, #tpu.memory_space<vmem>>, vector<2x32xf32>
      tpu.vector_store %arg9[%c0_195, %c0_196], %404 {strides = array<i32>} : memref<2x32xf32, #tpu.memory_space<vmem>>, vector<2x32xf32>,
      %cst_197 = arith.constant 0.000000e+00 : f32
      %406 = vector.broadcast %cst_197 : f32 to vector<2x32xf32>
      %c0_198 = arith.constant 0 : index
      %c0_199 = arith.constant 0 : index
      %407 = vector.load %arg11[%c0_198, %c0_199] : memref<2x32xf32, #tpu.memory_space<vmem>>, vector<2x32xf32>
      tpu.vector_store %arg11[%c0_198, %c0_199], %406 {strides = array<i32>} : memref<2x32xf32, #tpu.memory_space<vmem>>, vector<2x32xf32>,
      %cst_200 = arith.constant 0.000000e+00 : f32
      %408 = vector.broadcast %cst_200 : f32 to vector<2x32xf32>
      %c0_201 = arith.constant 0 : index
      %c0_202 = arith.constant 0 : index
      %409 = vector.load %arg10[%c0_201, %c0_202] : memref<2x32xf32, #tpu.memory_space<vmem>>, vector<2x32xf32>
      tpu.vector_store %arg10[%c0_201, %c0_202], %408 {strides = array<i32>} : memref<2x32xf32, #tpu.memory_space<vmem>>, vector<2x32xf32>,
      %cst_203 = arith.constant 0.000000e+00 : f32
      %410 = vector.broadcast %cst_203 : f32 to vector<2x32xf32>
      %c0_204 = arith.constant 0 : index
      %c0_205 = arith.constant 0 : index
      %411 = vector.load %arg12[%c0_204, %c0_205] : memref<2x32xf32, #tpu.memory_space<vmem>>, vector<2x32xf32>
      tpu.vector_store %arg12[%c0_204, %c0_205], %410 {strides = array<i32>} : memref<2x32xf32, #tpu.memory_space<vmem>>, vector<2x32xf32>,
    } else {
    }
    %c0 = arith.constant 0 : index
    %c0_1 = arith.constant 0 : index
    %3 = vector.load %arg3[%c0, %c0_1] : memref<32x128xf32, #tpu.memory_space<vmem>>, vector<32x128xf32>
    %c0_2 = arith.constant 0 : index
    %c0_3 = arith.constant 0 : index
    %4 = vector.load %arg5[%c0_2, %c0_3] : memref<32x128xf32, #tpu.memory_space<vmem>>, vector<32x128xf32>
    %c0_4 = arith.constant 0 : index
    %c0_5 = arith.constant 0 : index
    %5 = vector.load %arg4[%c0_4, %c0_5] : memref<32x128xf32, #tpu.memory_space<vmem>>, vector<32x128xf32>
    %c0_6 = arith.constant 0 : index
    %c0_7 = arith.constant 0 : index
    %6 = vector.load %arg6[%c0_6, %c0_7] : memref<1x128xf32, #tpu.memory_space<vmem>>, vector<1x128xf32>
    %7 = vector.shape_cast %6 : vector<1x128xf32> to vector<1x128xf32>
    %8 = vector.broadcast %7 : vector<1x128xf32> to vector<2x128xf32>
    %c0_i32_8 = arith.constant 0 : i32
    %9 = arith.index_cast %c0_i32_8 : i32 to index
    %c0_9 = arith.constant 0 : index
    %c0_10 = arith.constant 0 : index
    %10 = vector.load %arg2[%9, %c0_9, %c0_10] : memref<8x2x128xf32, #tpu.memory_space<vmem>>, vector<1x2x128xf32>
    %11 = vector.shape_cast %10 : vector<1x2x128xf32> to vector<2x128xf32>
    %c0_11 = arith.constant 0 : index
    %c0_12 = arith.constant 0 : index
    %12 = vector.load %arg9[%c0_11, %c0_12] : memref<2x32xf32, #tpu.memory_space<vmem>>, vector<2x32xf32>
    %cst = arith.constant dense<0.000000e+00> : vector<2x128xf32>
    %13 = tpu.matmul %12, %3, %cst {dimension_numbers = #tpu.dot_dimension_numbers<[1], [0], [0], [1], [0, 0, 1, 1], [], []>} : vector<2x32xf32>, vector<32x128xf32>, vector<2x128xf32> -> vector<2x128xf32>
    %14 = arith.addf %11, %13 : vector<2x128xf32>
    %c0_13 = arith.constant 0 : index
    %c0_14 = arith.constant 0 : index
    %15 = vector.load %arg11[%c0_13, %c0_14] : memref<2x32xf32, #tpu.memory_space<vmem>>, vector<2x32xf32>
    %16 = vector.extract_strided_slice %14 {offsets = [0, 0], sizes = [2, 96], strides = [1, 1]} : vector<2x128xf32> to vector<2x96xf32>
    %17 = arith.negf %16 : vector<2x96xf32>
    %18 = math.exp %17 : vector<2x96xf32>
    %cst_15 = arith.constant 1.000000e+00 : f32
    %19 = vector.broadcast %cst_15 : f32 to vector<2x96xf32>
    %20 = arith.addf %19, %18 : vector<2x96xf32>
    %21 = arith.divf %19, %20 : vector<2x96xf32>
    %22 = vector.extract_strided_slice %14 {offsets = [0, 96], sizes = [2, 32], strides = [1, 1]} : vector<2x128xf32> to vector<2x32xf32>
    %23 = math.tanh %22 : vector<2x32xf32>
    %24 = vector.extract_strided_slice %21 {offsets = [0, 0], sizes = [2, 32], strides = [1, 1]} : vector<2x96xf32> to vector<2x32xf32>
    %25 = vector.extract_strided_slice %21 {offsets = [0, 32], sizes = [2, 32], strides = [1, 1]} : vector<2x96xf32> to vector<2x32xf32>
    %26 = vector.extract_strided_slice %21 {offsets = [0, 64], sizes = [2, 32], strides = [1, 1]} : vector<2x96xf32> to vector<2x32xf32>
    %27 = arith.mulf %25, %15 : vector<2x32xf32>
    %28 = arith.mulf %24, %23 : vector<2x32xf32>
    %29 = arith.addf %27, %28 : vector<2x32xf32>
    %30 = math.tanh %29 : vector<2x32xf32>
    %31 = arith.mulf %26, %30 : vector<2x32xf32>
    %c0_16 = arith.constant 0 : index
    %c0_17 = arith.constant 0 : index
    %32 = vector.load %arg9[%c0_16, %c0_17] : memref<2x32xf32, #tpu.memory_space<vmem>>, vector<2x32xf32>
    tpu.vector_store %arg9[%c0_16, %c0_17], %31 {strides = array<i32>} : memref<2x32xf32, #tpu.memory_space<vmem>>, vector<2x32xf32>,
    %c0_18 = arith.constant 0 : index
    %c0_19 = arith.constant 0 : index
    %33 = vector.load %arg11[%c0_18, %c0_19] : memref<2x32xf32, #tpu.memory_space<vmem>>, vector<2x32xf32>
    tpu.vector_store %arg11[%c0_18, %c0_19], %29 {strides = array<i32>} : memref<2x32xf32, #tpu.memory_space<vmem>>, vector<2x32xf32>,
    %cst_20 = arith.constant dense<0.000000e+00> : vector<2x128xf32>
    %34 = tpu.matmul %31, %5, %cst_20 {dimension_numbers = #tpu.dot_dimension_numbers<[1], [0], [0], [1], [0, 0, 1, 1], [], []>} : vector<2x32xf32>, vector<32x128xf32>, vector<2x128xf32> -> vector<2x128xf32>
    %c0_21 = arith.constant 0 : index
    %c0_22 = arith.constant 0 : index
    %35 = vector.load %arg10[%c0_21, %c0_22] : memref<2x32xf32, #tpu.memory_space<vmem>>, vector<2x32xf32>
    %cst_23 = arith.constant dense<0.000000e+00> : vector<2x128xf32>
    %36 = tpu.matmul %35, %4, %cst_23 {dimension_numbers = #tpu.dot_dimension_numbers<[1], [0], [0], [1], [0, 0, 1, 1], [], []>} : vector<2x32xf32>, vector<32x128xf32>, vector<2x128xf32> -> vector<2x128xf32>
    %37 = arith.addf %34, %36 : vector<2x128xf32>
    %38 = arith.addf %37, %8 : vector<2x128xf32>
    %c0_24 = arith.constant 0 : index
    %c0_25 = arith.constant 0 : index
    %39 = vector.load %arg12[%c0_24, %c0_25] : memref<2x32xf32, #tpu.memory_space<vmem>>, vector<2x32xf32>
    %40 = vector.extract_strided_slice %38 {offsets = [0, 0], sizes = [2, 96], strides = [1, 1]} : vector<2x128xf32> to vector<2x96xf32>
    %41 = arith.negf %40 : vector<2x96xf32>
    %42 = math.exp %41 : vector<2x96xf32>
    %cst_26 = arith.constant 1.000000e+00 : f32
    %43 = vector.broadcast %cst_26 : f32 to vector<2x96xf32>
    %44 = arith.addf %43, %42 : vector<2x96xf32>
    %45 = arith.divf %43, %44 : vector<2x96xf32>
    %46 = vector.extract_strided_slice %38 {offsets = [0, 96], sizes = [2, 32], strides = [1, 1]} : vector<2x128xf32> to vector<2x32xf32>
    %47 = math.tanh %46 : vector<2x32xf32>
    %48 = vector.extract_strided_slice %45 {offsets = [0, 0], sizes = [2, 32], strides = [1, 1]} : vector<2x96xf32> to vector<2x32xf32>
    %49 = vector.extract_strided_slice %45 {offsets = [0, 32], sizes = [2, 32], strides = [1, 1]} : vector<2x96xf32> to vector<2x32xf32>
    %50 = vector.extract_strided_slice %45 {offsets = [0, 64], sizes = [2, 32], strides = [1, 1]} : vector<2x96xf32> to vector<2x32xf32>
    %51 = arith.mulf %49, %39 : vector<2x32xf32>
    %52 = arith.mulf %48, %47 : vector<2x32xf32>
    %53 = arith.addf %51, %52 : vector<2x32xf32>
    %54 = math.tanh %53 : vector<2x32xf32>
    %55 = arith.mulf %50, %54 : vector<2x32xf32>
    %c0_27 = arith.constant 0 : index
    %c0_28 = arith.constant 0 : index
    %56 = vector.load %arg10[%c0_27, %c0_28] : memref<2x32xf32, #tpu.memory_space<vmem>>, vector<2x32xf32>
    tpu.vector_store %arg10[%c0_27, %c0_28], %55 {strides = array<i32>} : memref<2x32xf32, #tpu.memory_space<vmem>>, vector<2x32xf32>,
    %c0_29 = arith.constant 0 : index
    %c0_30 = arith.constant 0 : index
    %57 = vector.load %arg12[%c0_29, %c0_30] : memref<2x32xf32, #tpu.memory_space<vmem>>, vector<2x32xf32>
    tpu.vector_store %arg12[%c0_29, %c0_30], %53 {strides = array<i32>} : memref<2x32xf32, #tpu.memory_space<vmem>>, vector<2x32xf32>,
    %c1_i32 = arith.constant 1 : i32
    %58 = arith.index_cast %c1_i32 : i32 to index
    %c0_31 = arith.constant 0 : index
    %c0_32 = arith.constant 0 : index
    %59 = vector.load %arg2[%58, %c0_31, %c0_32] : memref<8x2x128xf32, #tpu.memory_space<vmem>>, vector<1x2x128xf32>
    %60 = vector.shape_cast %59 : vector<1x2x128xf32> to vector<2x128xf32>
    %c0_33 = arith.constant 0 : index
    %c0_34 = arith.constant 0 : index
    %61 = vector.load %arg9[%c0_33, %c0_34] : memref<2x32xf32, #tpu.memory_space<vmem>>, vector<2x32xf32>
    %cst_35 = arith.constant dense<0.000000e+00> : vector<2x128xf32>
    %62 = tpu.matmul %61, %3, %cst_35 {dimension_numbers = #tpu.dot_dimension_numbers<[1], [0], [0], [1], [0, 0, 1, 1], [], []>} : vector<2x32xf32>, vector<32x128xf32>, vector<2x128xf32> -> vector<2x128xf32>
    %63 = arith.addf %60, %62 : vector<2x128xf32>
    %c0_36 = arith.constant 0 : index
    %c0_37 = arith.constant 0 : index
    %64 = vector.load %arg11[%c0_36, %c0_37] : memref<2x32xf32, #tpu.memory_space<vmem>>, vector<2x32xf32>
    %65 = vector.extract_strided_slice %63 {offsets = [0, 0], sizes = [2, 96], strides = [1, 1]} : vector<2x128xf32> to vector<2x96xf32>
    %66 = arith.negf %65 : vector<2x96xf32>
    %67 = math.exp %66 : vector<2x96xf32>
    %cst_38 = arith.constant 1.000000e+00 : f32
    %68 = vector.broadcast %cst_38 : f32 to vector<2x96xf32>
    %69 = arith.addf %68, %67 : vector<2x96xf32>
    %70 = arith.divf %68, %69 : vector<2x96xf32>
    %71 = vector.extract_strided_slice %63 {offsets = [0, 96], sizes = [2, 32], strides = [1, 1]} : vector<2x128xf32> to vector<2x32xf32>
    %72 = math.tanh %71 : vector<2x32xf32>
    %73 = vector.extract_strided_slice %70 {offsets = [0, 0], sizes = [2, 32], strides = [1, 1]} : vector<2x96xf32> to vector<2x32xf32>
    %74 = vector.extract_strided_slice %70 {offsets = [0, 32], sizes = [2, 32], strides = [1, 1]} : vector<2x96xf32> to vector<2x32xf32>
    %75 = vector.extract_strided_slice %70 {offsets = [0, 64], sizes = [2, 32], strides = [1, 1]} : vector<2x96xf32> to vector<2x32xf32>
    %76 = arith.mulf %74, %64 : vector<2x32xf32>
    %77 = arith.mulf %73, %72 : vector<2x32xf32>
    %78 = arith.addf %76, %77 : vector<2x32xf32>
    %79 = math.tanh %78 : vector<2x32xf32>
    %80 = arith.mulf %75, %79 : vector<2x32xf32>
    %c0_39 = arith.constant 0 : index
    %c0_40 = arith.constant 0 : index
    %81 = vector.load %arg9[%c0_39, %c0_40] : memref<2x32xf32, #tpu.memory_space<vmem>>, vector<2x32xf32>
    tpu.vector_store %arg9[%c0_39, %c0_40], %80 {strides = array<i32>} : memref<2x32xf32, #tpu.memory_space<vmem>>, vector<2x32xf32>,
    %c0_41 = arith.constant 0 : index
    %c0_42 = arith.constant 0 : index
    %82 = vector.load %arg11[%c0_41, %c0_42] : memref<2x32xf32, #tpu.memory_space<vmem>>, vector<2x32xf32>
    tpu.vector_store %arg11[%c0_41, %c0_42], %78 {strides = array<i32>} : memref<2x32xf32, #tpu.memory_space<vmem>>, vector<2x32xf32>,
    %cst_43 = arith.constant dense<0.000000e+00> : vector<2x128xf32>
    %83 = tpu.matmul %80, %5, %cst_43 {dimension_numbers = #tpu.dot_dimension_numbers<[1], [0], [0], [1], [0, 0, 1, 1], [], []>} : vector<2x32xf32>, vector<32x128xf32>, vector<2x128xf32> -> vector<2x128xf32>
    %c0_44 = arith.constant 0 : index
    %c0_45 = arith.constant 0 : index
    %84 = vector.load %arg10[%c0_44, %c0_45] : memref<2x32xf32, #tpu.memory_space<vmem>>, vector<2x32xf32>
    %cst_46 = arith.constant dense<0.000000e+00> : vector<2x128xf32>
    %85 = tpu.matmul %84, %4, %cst_46 {dimension_numbers = #tpu.dot_dimension_numbers<[1], [0], [0], [1], [0, 0, 1, 1], [], []>} : vector<2x32xf32>, vector<32x128xf32>, vector<2x128xf32> -> vector<2x128xf32>
    %86 = arith.addf %83, %85 : vector<2x128xf32>
    %87 = arith.addf %86, %8 : vector<2x128xf32>
    %c0_47 = arith.constant 0 : index
    %c0_48 = arith.constant 0 : index
    %88 = vector.load %arg12[%c0_47, %c0_48] : memref<2x32xf32, #tpu.memory_space<vmem>>, vector<2x32xf32>
    %89 = vector.extract_strided_slice %87 {offsets = [0, 0], sizes = [2, 96], strides = [1, 1]} : vector<2x128xf32> to vector<2x96xf32>
    %90 = arith.negf %89 : vector<2x96xf32>
    %91 = math.exp %90 : vector<2x96xf32>
    %cst_49 = arith.constant 1.000000e+00 : f32
    %92 = vector.broadcast %cst_49 : f32 to vector<2x96xf32>
    %93 = arith.addf %92, %91 : vector<2x96xf32>
    %94 = arith.divf %92, %93 : vector<2x96xf32>
    %95 = vector.extract_strided_slice %87 {offsets = [0, 96], sizes = [2, 32], strides = [1, 1]} : vector<2x128xf32> to vector<2x32xf32>
    %96 = math.tanh %95 : vector<2x32xf32>
    %97 = vector.extract_strided_slice %94 {offsets = [0, 0], sizes = [2, 32], strides = [1, 1]} : vector<2x96xf32> to vector<2x32xf32>
    %98 = vector.extract_strided_slice %94 {offsets = [0, 32], sizes = [2, 32], strides = [1, 1]} : vector<2x96xf32> to vector<2x32xf32>
    %99 = vector.extract_strided_slice %94 {offsets = [0, 64], sizes = [2, 32], strides = [1, 1]} : vector<2x96xf32> to vector<2x32xf32>
    %100 = arith.mulf %98, %88 : vector<2x32xf32>
    %101 = arith.mulf %97, %96 : vector<2x32xf32>
    %102 = arith.addf %100, %101 : vector<2x32xf32>
    %103 = math.tanh %102 : vector<2x32xf32>
    %104 = arith.mulf %99, %103 : vector<2x32xf32>
    %c0_50 = arith.constant 0 : index
    %c0_51 = arith.constant 0 : index
    %105 = vector.load %arg10[%c0_50, %c0_51] : memref<2x32xf32, #tpu.memory_space<vmem>>, vector<2x32xf32>
    tpu.vector_store %arg10[%c0_50, %c0_51], %104 {strides = array<i32>} : memref<2x32xf32, #tpu.memory_space<vmem>>, vector<2x32xf32>,
    %c0_52 = arith.constant 0 : index
    %c0_53 = arith.constant 0 : index
    %106 = vector.load %arg12[%c0_52, %c0_53] : memref<2x32xf32, #tpu.memory_space<vmem>>, vector<2x32xf32>
    tpu.vector_store %arg12[%c0_52, %c0_53], %102 {strides = array<i32>} : memref<2x32xf32, #tpu.memory_space<vmem>>, vector<2x32xf32>,
    %c2_i32 = arith.constant 2 : i32
    %107 = arith.index_cast %c2_i32 : i32 to index
    %c0_54 = arith.constant 0 : index
    %c0_55 = arith.constant 0 : index
    %108 = vector.load %arg2[%107, %c0_54, %c0_55] : memref<8x2x128xf32, #tpu.memory_space<vmem>>, vector<1x2x128xf32>
    %109 = vector.shape_cast %108 : vector<1x2x128xf32> to vector<2x128xf32>
    %c0_56 = arith.constant 0 : index
    %c0_57 = arith.constant 0 : index
    %110 = vector.load %arg9[%c0_56, %c0_57] : memref<2x32xf32, #tpu.memory_space<vmem>>, vector<2x32xf32>
    %cst_58 = arith.constant dense<0.000000e+00> : vector<2x128xf32>
    %111 = tpu.matmul %110, %3, %cst_58 {dimension_numbers = #tpu.dot_dimension_numbers<[1], [0], [0], [1], [0, 0, 1, 1], [], []>} : vector<2x32xf32>, vector<32x128xf32>, vector<2x128xf32> -> vector<2x128xf32>
    %112 = arith.addf %109, %111 : vector<2x128xf32>
    %c0_59 = arith.constant 0 : index
    %c0_60 = arith.constant 0 : index
    %113 = vector.load %arg11[%c0_59, %c0_60] : memref<2x32xf32, #tpu.memory_space<vmem>>, vector<2x32xf32>
    %114 = vector.extract_strided_slice %112 {offsets = [0, 0], sizes = [2, 96], strides = [1, 1]} : vector<2x128xf32> to vector<2x96xf32>
    %115 = arith.negf %114 : vector<2x96xf32>
    %116 = math.exp %115 : vector<2x96xf32>
    %cst_61 = arith.constant 1.000000e+00 : f32
    %117 = vector.broadcast %cst_61 : f32 to vector<2x96xf32>
    %118 = arith.addf %117, %116 : vector<2x96xf32>
    %119 = arith.divf %117, %118 : vector<2x96xf32>
    %120 = vector.extract_strided_slice %112 {offsets = [0, 96], sizes = [2, 32], strides = [1, 1]} : vector<2x128xf32> to vector<2x32xf32>
    %121 = math.tanh %120 : vector<2x32xf32>
    %122 = vector.extract_strided_slice %119 {offsets = [0, 0], sizes = [2, 32], strides = [1, 1]} : vector<2x96xf32> to vector<2x32xf32>
    %123 = vector.extract_strided_slice %119 {offsets = [0, 32], sizes = [2, 32], strides = [1, 1]} : vector<2x96xf32> to vector<2x32xf32>
    %124 = vector.extract_strided_slice %119 {offsets = [0, 64], sizes = [2, 32], strides = [1, 1]} : vector<2x96xf32> to vector<2x32xf32>
    %125 = arith.mulf %123, %113 : vector<2x32xf32>
    %126 = arith.mulf %122, %121 : vector<2x32xf32>
    %127 = arith.addf %125, %126 : vector<2x32xf32>
    %128 = math.tanh %127 : vector<2x32xf32>
    %129 = arith.mulf %124, %128 : vector<2x32xf32>
    %c0_62 = arith.constant 0 : index
    %c0_63 = arith.constant 0 : index
    %130 = vector.load %arg9[%c0_62, %c0_63] : memref<2x32xf32, #tpu.memory_space<vmem>>, vector<2x32xf32>
    tpu.vector_store %arg9[%c0_62, %c0_63], %129 {strides = array<i32>} : memref<2x32xf32, #tpu.memory_space<vmem>>, vector<2x32xf32>,
    %c0_64 = arith.constant 0 : index
    %c0_65 = arith.constant 0 : index
    %131 = vector.load %arg11[%c0_64, %c0_65] : memref<2x32xf32, #tpu.memory_space<vmem>>, vector<2x32xf32>
    tpu.vector_store %arg11[%c0_64, %c0_65], %127 {strides = array<i32>} : memref<2x32xf32, #tpu.memory_space<vmem>>, vector<2x32xf32>,
    %cst_66 = arith.constant dense<0.000000e+00> : vector<2x128xf32>
    %132 = tpu.matmul %129, %5, %cst_66 {dimension_numbers = #tpu.dot_dimension_numbers<[1], [0], [0], [1], [0, 0, 1, 1], [], []>} : vector<2x32xf32>, vector<32x128xf32>, vector<2x128xf32> -> vector<2x128xf32>
    %c0_67 = arith.constant 0 : index
    %c0_68 = arith.constant 0 : index
    %133 = vector.load %arg10[%c0_67, %c0_68] : memref<2x32xf32, #tpu.memory_space<vmem>>, vector<2x32xf32>
    %cst_69 = arith.constant dense<0.000000e+00> : vector<2x128xf32>
    %134 = tpu.matmul %133, %4, %cst_69 {dimension_numbers = #tpu.dot_dimension_numbers<[1], [0], [0], [1], [0, 0, 1, 1], [], []>} : vector<2x32xf32>, vector<32x128xf32>, vector<2x128xf32> -> vector<2x128xf32>
    %135 = arith.addf %132, %134 : vector<2x128xf32>
    %136 = arith.addf %135, %8 : vector<2x128xf32>
    %c0_70 = arith.constant 0 : index
    %c0_71 = arith.constant 0 : index
    %137 = vector.load %arg12[%c0_70, %c0_71] : memref<2x32xf32, #tpu.memory_space<vmem>>, vector<2x32xf32>
    %138 = vector.extract_strided_slice %136 {offsets = [0, 0], sizes = [2, 96], strides = [1, 1]} : vector<2x128xf32> to vector<2x96xf32>
    %139 = arith.negf %138 : vector<2x96xf32>
    %140 = math.exp %139 : vector<2x96xf32>
    %cst_72 = arith.constant 1.000000e+00 : f32
    %141 = vector.broadcast %cst_72 : f32 to vector<2x96xf32>
    %142 = arith.addf %141, %140 : vector<2x96xf32>
    %143 = arith.divf %141, %142 : vector<2x96xf32>
    %144 = vector.extract_strided_slice %136 {offsets = [0, 96], sizes = [2, 32], strides = [1, 1]} : vector<2x128xf32> to vector<2x32xf32>
    %145 = math.tanh %144 : vector<2x32xf32>
    %146 = vector.extract_strided_slice %143 {offsets = [0, 0], sizes = [2, 32], strides = [1, 1]} : vector<2x96xf32> to vector<2x32xf32>
    %147 = vector.extract_strided_slice %143 {offsets = [0, 32], sizes = [2, 32], strides = [1, 1]} : vector<2x96xf32> to vector<2x32xf32>
    %148 = vector.extract_strided_slice %143 {offsets = [0, 64], sizes = [2, 32], strides = [1, 1]} : vector<2x96xf32> to vector<2x32xf32>
    %149 = arith.mulf %147, %137 : vector<2x32xf32>
    %150 = arith.mulf %146, %145 : vector<2x32xf32>
    %151 = arith.addf %149, %150 : vector<2x32xf32>
    %152 = math.tanh %151 : vector<2x32xf32>
    %153 = arith.mulf %148, %152 : vector<2x32xf32>
    %c0_73 = arith.constant 0 : index
    %c0_74 = arith.constant 0 : index
    %154 = vector.load %arg10[%c0_73, %c0_74] : memref<2x32xf32, #tpu.memory_space<vmem>>, vector<2x32xf32>
    tpu.vector_store %arg10[%c0_73, %c0_74], %153 {strides = array<i32>} : memref<2x32xf32, #tpu.memory_space<vmem>>, vector<2x32xf32>,
    %c0_75 = arith.constant 0 : index
    %c0_76 = arith.constant 0 : index
    %155 = vector.load %arg12[%c0_75, %c0_76] : memref<2x32xf32, #tpu.memory_space<vmem>>, vector<2x32xf32>
    tpu.vector_store %arg12[%c0_75, %c0_76], %151 {strides = array<i32>} : memref<2x32xf32, #tpu.memory_space<vmem>>, vector<2x32xf32>,
    %c3_i32 = arith.constant 3 : i32
    %156 = arith.index_cast %c3_i32 : i32 to index
    %c0_77 = arith.constant 0 : index
    %c0_78 = arith.constant 0 : index
    %157 = vector.load %arg2[%156, %c0_77, %c0_78] : memref<8x2x128xf32, #tpu.memory_space<vmem>>, vector<1x2x128xf32>
    %158 = vector.shape_cast %157 : vector<1x2x128xf32> to vector<2x128xf32>
    %c0_79 = arith.constant 0 : index
    %c0_80 = arith.constant 0 : index
    %159 = vector.load %arg9[%c0_79, %c0_80] : memref<2x32xf32, #tpu.memory_space<vmem>>, vector<2x32xf32>
    %cst_81 = arith.constant dense<0.000000e+00> : vector<2x128xf32>
    %160 = tpu.matmul %159, %3, %cst_81 {dimension_numbers = #tpu.dot_dimension_numbers<[1], [0], [0], [1], [0, 0, 1, 1], [], []>} : vector<2x32xf32>, vector<32x128xf32>, vector<2x128xf32> -> vector<2x128xf32>
    %161 = arith.addf %158, %160 : vector<2x128xf32>
    %c0_82 = arith.constant 0 : index
    %c0_83 = arith.constant 0 : index
    %162 = vector.load %arg11[%c0_82, %c0_83] : memref<2x32xf32, #tpu.memory_space<vmem>>, vector<2x32xf32>
    %163 = vector.extract_strided_slice %161 {offsets = [0, 0], sizes = [2, 96], strides = [1, 1]} : vector<2x128xf32> to vector<2x96xf32>
    %164 = arith.negf %163 : vector<2x96xf32>
    %165 = math.exp %164 : vector<2x96xf32>
    %cst_84 = arith.constant 1.000000e+00 : f32
    %166 = vector.broadcast %cst_84 : f32 to vector<2x96xf32>
    %167 = arith.addf %166, %165 : vector<2x96xf32>
    %168 = arith.divf %166, %167 : vector<2x96xf32>
    %169 = vector.extract_strided_slice %161 {offsets = [0, 96], sizes = [2, 32], strides = [1, 1]} : vector<2x128xf32> to vector<2x32xf32>
    %170 = math.tanh %169 : vector<2x32xf32>
    %171 = vector.extract_strided_slice %168 {offsets = [0, 0], sizes = [2, 32], strides = [1, 1]} : vector<2x96xf32> to vector<2x32xf32>
    %172 = vector.extract_strided_slice %168 {offsets = [0, 32], sizes = [2, 32], strides = [1, 1]} : vector<2x96xf32> to vector<2x32xf32>
    %173 = vector.extract_strided_slice %168 {offsets = [0, 64], sizes = [2, 32], strides = [1, 1]} : vector<2x96xf32> to vector<2x32xf32>
    %174 = arith.mulf %172, %162 : vector<2x32xf32>
    %175 = arith.mulf %171, %170 : vector<2x32xf32>
    %176 = arith.addf %174, %175 : vector<2x32xf32>
    %177 = math.tanh %176 : vector<2x32xf32>
    %178 = arith.mulf %173, %177 : vector<2x32xf32>
    %c0_85 = arith.constant 0 : index
    %c0_86 = arith.constant 0 : index
    %179 = vector.load %arg9[%c0_85, %c0_86] : memref<2x32xf32, #tpu.memory_space<vmem>>, vector<2x32xf32>
    tpu.vector_store %arg9[%c0_85, %c0_86], %178 {strides = array<i32>} : memref<2x32xf32, #tpu.memory_space<vmem>>, vector<2x32xf32>,
    %c0_87 = arith.constant 0 : index
    %c0_88 = arith.constant 0 : index
    %180 = vector.load %arg11[%c0_87, %c0_88] : memref<2x32xf32, #tpu.memory_space<vmem>>, vector<2x32xf32>
    tpu.vector_store %arg11[%c0_87, %c0_88], %176 {strides = array<i32>} : memref<2x32xf32, #tpu.memory_space<vmem>>, vector<2x32xf32>,
    %cst_89 = arith.constant dense<0.000000e+00> : vector<2x128xf32>
    %181 = tpu.matmul %178, %5, %cst_89 {dimension_numbers = #tpu.dot_dimension_numbers<[1], [0], [0], [1], [0, 0, 1, 1], [], []>} : vector<2x32xf32>, vector<32x128xf32>, vector<2x128xf32> -> vector<2x128xf32>
    %c0_90 = arith.constant 0 : index
    %c0_91 = arith.constant 0 : index
    %182 = vector.load %arg10[%c0_90, %c0_91] : memref<2x32xf32, #tpu.memory_space<vmem>>, vector<2x32xf32>
    %cst_92 = arith.constant dense<0.000000e+00> : vector<2x128xf32>
    %183 = tpu.matmul %182, %4, %cst_92 {dimension_numbers = #tpu.dot_dimension_numbers<[1], [0], [0], [1], [0, 0, 1, 1], [], []>} : vector<2x32xf32>, vector<32x128xf32>, vector<2x128xf32> -> vector<2x128xf32>
    %184 = arith.addf %181, %183 : vector<2x128xf32>
    %185 = arith.addf %184, %8 : vector<2x128xf32>
    %c0_93 = arith.constant 0 : index
    %c0_94 = arith.constant 0 : index
    %186 = vector.load %arg12[%c0_93, %c0_94] : memref<2x32xf32, #tpu.memory_space<vmem>>, vector<2x32xf32>
    %187 = vector.extract_strided_slice %185 {offsets = [0, 0], sizes = [2, 96], strides = [1, 1]} : vector<2x128xf32> to vector<2x96xf32>
    %188 = arith.negf %187 : vector<2x96xf32>
    %189 = math.exp %188 : vector<2x96xf32>
    %cst_95 = arith.constant 1.000000e+00 : f32
    %190 = vector.broadcast %cst_95 : f32 to vector<2x96xf32>
    %191 = arith.addf %190, %189 : vector<2x96xf32>
    %192 = arith.divf %190, %191 : vector<2x96xf32>
    %193 = vector.extract_strided_slice %185 {offsets = [0, 96], sizes = [2, 32], strides = [1, 1]} : vector<2x128xf32> to vector<2x32xf32>
    %194 = math.tanh %193 : vector<2x32xf32>
    %195 = vector.extract_strided_slice %192 {offsets = [0, 0], sizes = [2, 32], strides = [1, 1]} : vector<2x96xf32> to vector<2x32xf32>
    %196 = vector.extract_strided_slice %192 {offsets = [0, 32], sizes = [2, 32], strides = [1, 1]} : vector<2x96xf32> to vector<2x32xf32>
    %197 = vector.extract_strided_slice %192 {offsets = [0, 64], sizes = [2, 32], strides = [1, 1]} : vector<2x96xf32> to vector<2x32xf32>
    %198 = arith.mulf %196, %186 : vector<2x32xf32>
    %199 = arith.mulf %195, %194 : vector<2x32xf32>
    %200 = arith.addf %198, %199 : vector<2x32xf32>
    %201 = math.tanh %200 : vector<2x32xf32>
    %202 = arith.mulf %197, %201 : vector<2x32xf32>
    %c0_96 = arith.constant 0 : index
    %c0_97 = arith.constant 0 : index
    %203 = vector.load %arg10[%c0_96, %c0_97] : memref<2x32xf32, #tpu.memory_space<vmem>>, vector<2x32xf32>
    tpu.vector_store %arg10[%c0_96, %c0_97], %202 {strides = array<i32>} : memref<2x32xf32, #tpu.memory_space<vmem>>, vector<2x32xf32>,
    %c0_98 = arith.constant 0 : index
    %c0_99 = arith.constant 0 : index
    %204 = vector.load %arg12[%c0_98, %c0_99] : memref<2x32xf32, #tpu.memory_space<vmem>>, vector<2x32xf32>
    tpu.vector_store %arg12[%c0_98, %c0_99], %200 {strides = array<i32>} : memref<2x32xf32, #tpu.memory_space<vmem>>, vector<2x32xf32>,
    %c4_i32 = arith.constant 4 : i32
    %205 = arith.index_cast %c4_i32 : i32 to index
    %c0_100 = arith.constant 0 : index
    %c0_101 = arith.constant 0 : index
    %206 = vector.load %arg2[%205, %c0_100, %c0_101] : memref<8x2x128xf32, #tpu.memory_space<vmem>>, vector<1x2x128xf32>
    %207 = vector.shape_cast %206 : vector<1x2x128xf32> to vector<2x128xf32>
    %c0_102 = arith.constant 0 : index
    %c0_103 = arith.constant 0 : index
    %208 = vector.load %arg9[%c0_102, %c0_103] : memref<2x32xf32, #tpu.memory_space<vmem>>, vector<2x32xf32>
    %cst_104 = arith.constant dense<0.000000e+00> : vector<2x128xf32>
    %209 = tpu.matmul %208, %3, %cst_104 {dimension_numbers = #tpu.dot_dimension_numbers<[1], [0], [0], [1], [0, 0, 1, 1], [], []>} : vector<2x32xf32>, vector<32x128xf32>, vector<2x128xf32> -> vector<2x128xf32>
    %210 = arith.addf %207, %209 : vector<2x128xf32>
    %c0_105 = arith.constant 0 : index
    %c0_106 = arith.constant 0 : index
    %211 = vector.load %arg11[%c0_105, %c0_106] : memref<2x32xf32, #tpu.memory_space<vmem>>, vector<2x32xf32>
    %212 = vector.extract_strided_slice %210 {offsets = [0, 0], sizes = [2, 96], strides = [1, 1]} : vector<2x128xf32> to vector<2x96xf32>
    %213 = arith.negf %212 : vector<2x96xf32>
    %214 = math.exp %213 : vector<2x96xf32>
    %cst_107 = arith.constant 1.000000e+00 : f32
    %215 = vector.broadcast %cst_107 : f32 to vector<2x96xf32>
    %216 = arith.addf %215, %214 : vector<2x96xf32>
    %217 = arith.divf %215, %216 : vector<2x96xf32>
    %218 = vector.extract_strided_slice %210 {offsets = [0, 96], sizes = [2, 32], strides = [1, 1]} : vector<2x128xf32> to vector<2x32xf32>
    %219 = math.tanh %218 : vector<2x32xf32>
    %220 = vector.extract_strided_slice %217 {offsets = [0, 0], sizes = [2, 32], strides = [1, 1]} : vector<2x96xf32> to vector<2x32xf32>
    %221 = vector.extract_strided_slice %217 {offsets = [0, 32], sizes = [2, 32], strides = [1, 1]} : vector<2x96xf32> to vector<2x32xf32>
    %222 = vector.extract_strided_slice %217 {offsets = [0, 64], sizes = [2, 32], strides = [1, 1]} : vector<2x96xf32> to vector<2x32xf32>
    %223 = arith.mulf %221, %211 : vector<2x32xf32>
    %224 = arith.mulf %220, %219 : vector<2x32xf32>
    %225 = arith.addf %223, %224 : vector<2x32xf32>
    %226 = math.tanh %225 : vector<2x32xf32>
    %227 = arith.mulf %222, %226 : vector<2x32xf32>
    %c0_108 = arith.constant 0 : index
    %c0_109 = arith.constant 0 : index
    %228 = vector.load %arg9[%c0_108, %c0_109] : memref<2x32xf32, #tpu.memory_space<vmem>>, vector<2x32xf32>
    tpu.vector_store %arg9[%c0_108, %c0_109], %227 {strides = array<i32>} : memref<2x32xf32, #tpu.memory_space<vmem>>, vector<2x32xf32>,
    %c0_110 = arith.constant 0 : index
    %c0_111 = arith.constant 0 : index
    %229 = vector.load %arg11[%c0_110, %c0_111] : memref<2x32xf32, #tpu.memory_space<vmem>>, vector<2x32xf32>
    tpu.vector_store %arg11[%c0_110, %c0_111], %225 {strides = array<i32>} : memref<2x32xf32, #tpu.memory_space<vmem>>, vector<2x32xf32>,
    %cst_112 = arith.constant dense<0.000000e+00> : vector<2x128xf32>
    %230 = tpu.matmul %227, %5, %cst_112 {dimension_numbers = #tpu.dot_dimension_numbers<[1], [0], [0], [1], [0, 0, 1, 1], [], []>} : vector<2x32xf32>, vector<32x128xf32>, vector<2x128xf32> -> vector<2x128xf32>
    %c0_113 = arith.constant 0 : index
    %c0_114 = arith.constant 0 : index
    %231 = vector.load %arg10[%c0_113, %c0_114] : memref<2x32xf32, #tpu.memory_space<vmem>>, vector<2x32xf32>
    %cst_115 = arith.constant dense<0.000000e+00> : vector<2x128xf32>
    %232 = tpu.matmul %231, %4, %cst_115 {dimension_numbers = #tpu.dot_dimension_numbers<[1], [0], [0], [1], [0, 0, 1, 1], [], []>} : vector<2x32xf32>, vector<32x128xf32>, vector<2x128xf32> -> vector<2x128xf32>
    %233 = arith.addf %230, %232 : vector<2x128xf32>
    %234 = arith.addf %233, %8 : vector<2x128xf32>
    %c0_116 = arith.constant 0 : index
    %c0_117 = arith.constant 0 : index
    %235 = vector.load %arg12[%c0_116, %c0_117] : memref<2x32xf32, #tpu.memory_space<vmem>>, vector<2x32xf32>
    %236 = vector.extract_strided_slice %234 {offsets = [0, 0], sizes = [2, 96], strides = [1, 1]} : vector<2x128xf32> to vector<2x96xf32>
    %237 = arith.negf %236 : vector<2x96xf32>
    %238 = math.exp %237 : vector<2x96xf32>
    %cst_118 = arith.constant 1.000000e+00 : f32
    %239 = vector.broadcast %cst_118 : f32 to vector<2x96xf32>
    %240 = arith.addf %239, %238 : vector<2x96xf32>
    %241 = arith.divf %239, %240 : vector<2x96xf32>
    %242 = vector.extract_strided_slice %234 {offsets = [0, 96], sizes = [2, 32], strides = [1, 1]} : vector<2x128xf32> to vector<2x32xf32>
    %243 = math.tanh %242 : vector<2x32xf32>
    %244 = vector.extract_strided_slice %241 {offsets = [0, 0], sizes = [2, 32], strides = [1, 1]} : vector<2x96xf32> to vector<2x32xf32>
    %245 = vector.extract_strided_slice %241 {offsets = [0, 32], sizes = [2, 32], strides = [1, 1]} : vector<2x96xf32> to vector<2x32xf32>
    %246 = vector.extract_strided_slice %241 {offsets = [0, 64], sizes = [2, 32], strides = [1, 1]} : vector<2x96xf32> to vector<2x32xf32>
    %247 = arith.mulf %245, %235 : vector<2x32xf32>
    %248 = arith.mulf %244, %243 : vector<2x32xf32>
    %249 = arith.addf %247, %248 : vector<2x32xf32>
    %250 = math.tanh %249 : vector<2x32xf32>
    %251 = arith.mulf %246, %250 : vector<2x32xf32>
    %c0_119 = arith.constant 0 : index
    %c0_120 = arith.constant 0 : index
    %252 = vector.load %arg10[%c0_119, %c0_120] : memref<2x32xf32, #tpu.memory_space<vmem>>, vector<2x32xf32>
    tpu.vector_store %arg10[%c0_119, %c0_120], %251 {strides = array<i32>} : memref<2x32xf32, #tpu.memory_space<vmem>>, vector<2x32xf32>,
    %c0_121 = arith.constant 0 : index
    %c0_122 = arith.constant 0 : index
    %253 = vector.load %arg12[%c0_121, %c0_122] : memref<2x32xf32, #tpu.memory_space<vmem>>, vector<2x32xf32>
    tpu.vector_store %arg12[%c0_121, %c0_122], %249 {strides = array<i32>} : memref<2x32xf32, #tpu.memory_space<vmem>>, vector<2x32xf32>,
    %c5_i32 = arith.constant 5 : i32
    %254 = arith.index_cast %c5_i32 : i32 to index
    %c0_123 = arith.constant 0 : index
    %c0_124 = arith.constant 0 : index
    %255 = vector.load %arg2[%254, %c0_123, %c0_124] : memref<8x2x128xf32, #tpu.memory_space<vmem>>, vector<1x2x128xf32>
    %256 = vector.shape_cast %255 : vector<1x2x128xf32> to vector<2x128xf32>
    %c0_125 = arith.constant 0 : index
    %c0_126 = arith.constant 0 : index
    %257 = vector.load %arg9[%c0_125, %c0_126] : memref<2x32xf32, #tpu.memory_space<vmem>>, vector<2x32xf32>
    %cst_127 = arith.constant dense<0.000000e+00> : vector<2x128xf32>
    %258 = tpu.matmul %257, %3, %cst_127 {dimension_numbers = #tpu.dot_dimension_numbers<[1], [0], [0], [1], [0, 0, 1, 1], [], []>} : vector<2x32xf32>, vector<32x128xf32>, vector<2x128xf32> -> vector<2x128xf32>
    %259 = arith.addf %256, %258 : vector<2x128xf32>
    %c0_128 = arith.constant 0 : index
    %c0_129 = arith.constant 0 : index
    %260 = vector.load %arg11[%c0_128, %c0_129] : memref<2x32xf32, #tpu.memory_space<vmem>>, vector<2x32xf32>
    %261 = vector.extract_strided_slice %259 {offsets = [0, 0], sizes = [2, 96], strides = [1, 1]} : vector<2x128xf32> to vector<2x96xf32>
    %262 = arith.negf %261 : vector<2x96xf32>
    %263 = math.exp %262 : vector<2x96xf32>
    %cst_130 = arith.constant 1.000000e+00 : f32
    %264 = vector.broadcast %cst_130 : f32 to vector<2x96xf32>
    %265 = arith.addf %264, %263 : vector<2x96xf32>
    %266 = arith.divf %264, %265 : vector<2x96xf32>
    %267 = vector.extract_strided_slice %259 {offsets = [0, 96], sizes = [2, 32], strides = [1, 1]} : vector<2x128xf32> to vector<2x32xf32>
    %268 = math.tanh %267 : vector<2x32xf32>
    %269 = vector.extract_strided_slice %266 {offsets = [0, 0], sizes = [2, 32], strides = [1, 1]} : vector<2x96xf32> to vector<2x32xf32>
    %270 = vector.extract_strided_slice %266 {offsets = [0, 32], sizes = [2, 32], strides = [1, 1]} : vector<2x96xf32> to vector<2x32xf32>
    %271 = vector.extract_strided_slice %266 {offsets = [0, 64], sizes = [2, 32], strides = [1, 1]} : vector<2x96xf32> to vector<2x32xf32>
    %272 = arith.mulf %270, %260 : vector<2x32xf32>
    %273 = arith.mulf %269, %268 : vector<2x32xf32>
    %274 = arith.addf %272, %273 : vector<2x32xf32>
    %275 = math.tanh %274 : vector<2x32xf32>
    %276 = arith.mulf %271, %275 : vector<2x32xf32>
    %c0_131 = arith.constant 0 : index
    %c0_132 = arith.constant 0 : index
    %277 = vector.load %arg9[%c0_131, %c0_132] : memref<2x32xf32, #tpu.memory_space<vmem>>, vector<2x32xf32>
    tpu.vector_store %arg9[%c0_131, %c0_132], %276 {strides = array<i32>} : memref<2x32xf32, #tpu.memory_space<vmem>>, vector<2x32xf32>,
    %c0_133 = arith.constant 0 : index
    %c0_134 = arith.constant 0 : index
    %278 = vector.load %arg11[%c0_133, %c0_134] : memref<2x32xf32, #tpu.memory_space<vmem>>, vector<2x32xf32>
    tpu.vector_store %arg11[%c0_133, %c0_134], %274 {strides = array<i32>} : memref<2x32xf32, #tpu.memory_space<vmem>>, vector<2x32xf32>,
    %cst_135 = arith.constant dense<0.000000e+00> : vector<2x128xf32>
    %279 = tpu.matmul %276, %5, %cst_135 {dimension_numbers = #tpu.dot_dimension_numbers<[1], [0], [0], [1], [0, 0, 1, 1], [], []>} : vector<2x32xf32>, vector<32x128xf32>, vector<2x128xf32> -> vector<2x128xf32>
    %c0_136 = arith.constant 0 : index
    %c0_137 = arith.constant 0 : index
    %280 = vector.load %arg10[%c0_136, %c0_137] : memref<2x32xf32, #tpu.memory_space<vmem>>, vector<2x32xf32>
    %cst_138 = arith.constant dense<0.000000e+00> : vector<2x128xf32>
    %281 = tpu.matmul %280, %4, %cst_138 {dimension_numbers = #tpu.dot_dimension_numbers<[1], [0], [0], [1], [0, 0, 1, 1], [], []>} : vector<2x32xf32>, vector<32x128xf32>, vector<2x128xf32> -> vector<2x128xf32>
    %282 = arith.addf %279, %281 : vector<2x128xf32>
    %283 = arith.addf %282, %8 : vector<2x128xf32>
    %c0_139 = arith.constant 0 : index
    %c0_140 = arith.constant 0 : index
    %284 = vector.load %arg12[%c0_139, %c0_140] : memref<2x32xf32, #tpu.memory_space<vmem>>, vector<2x32xf32>
    %285 = vector.extract_strided_slice %283 {offsets = [0, 0], sizes = [2, 96], strides = [1, 1]} : vector<2x128xf32> to vector<2x96xf32>
    %286 = arith.negf %285 : vector<2x96xf32>
    %287 = math.exp %286 : vector<2x96xf32>
    %cst_141 = arith.constant 1.000000e+00 : f32
    %288 = vector.broadcast %cst_141 : f32 to vector<2x96xf32>
    %289 = arith.addf %288, %287 : vector<2x96xf32>
    %290 = arith.divf %288, %289 : vector<2x96xf32>
    %291 = vector.extract_strided_slice %283 {offsets = [0, 96], sizes = [2, 32], strides = [1, 1]} : vector<2x128xf32> to vector<2x32xf32>
    %292 = math.tanh %291 : vector<2x32xf32>
    %293 = vector.extract_strided_slice %290 {offsets = [0, 0], sizes = [2, 32], strides = [1, 1]} : vector<2x96xf32> to vector<2x32xf32>
    %294 = vector.extract_strided_slice %290 {offsets = [0, 32], sizes = [2, 32], strides = [1, 1]} : vector<2x96xf32> to vector<2x32xf32>
    %295 = vector.extract_strided_slice %290 {offsets = [0, 64], sizes = [2, 32], strides = [1, 1]} : vector<2x96xf32> to vector<2x32xf32>
    %296 = arith.mulf %294, %284 : vector<2x32xf32>
    %297 = arith.mulf %293, %292 : vector<2x32xf32>
    %298 = arith.addf %296, %297 : vector<2x32xf32>
    %299 = math.tanh %298 : vector<2x32xf32>
    %300 = arith.mulf %295, %299 : vector<2x32xf32>
    %c0_142 = arith.constant 0 : index
    %c0_143 = arith.constant 0 : index
    %301 = vector.load %arg10[%c0_142, %c0_143] : memref<2x32xf32, #tpu.memory_space<vmem>>, vector<2x32xf32>
    tpu.vector_store %arg10[%c0_142, %c0_143], %300 {strides = array<i32>} : memref<2x32xf32, #tpu.memory_space<vmem>>, vector<2x32xf32>,
    %c0_144 = arith.constant 0 : index
    %c0_145 = arith.constant 0 : index
    %302 = vector.load %arg12[%c0_144, %c0_145] : memref<2x32xf32, #tpu.memory_space<vmem>>, vector<2x32xf32>
    tpu.vector_store %arg12[%c0_144, %c0_145], %298 {strides = array<i32>} : memref<2x32xf32, #tpu.memory_space<vmem>>, vector<2x32xf32>,
    %c6_i32 = arith.constant 6 : i32
    %303 = arith.index_cast %c6_i32 : i32 to index
    %c0_146 = arith.constant 0 : index
    %c0_147 = arith.constant 0 : index
    %304 = vector.load %arg2[%303, %c0_146, %c0_147] : memref<8x2x128xf32, #tpu.memory_space<vmem>>, vector<1x2x128xf32>
    %305 = vector.shape_cast %304 : vector<1x2x128xf32> to vector<2x128xf32>
    %c0_148 = arith.constant 0 : index
    %c0_149 = arith.constant 0 : index
    %306 = vector.load %arg9[%c0_148, %c0_149] : memref<2x32xf32, #tpu.memory_space<vmem>>, vector<2x32xf32>
    %cst_150 = arith.constant dense<0.000000e+00> : vector<2x128xf32>
    %307 = tpu.matmul %306, %3, %cst_150 {dimension_numbers = #tpu.dot_dimension_numbers<[1], [0], [0], [1], [0, 0, 1, 1], [], []>} : vector<2x32xf32>, vector<32x128xf32>, vector<2x128xf32> -> vector<2x128xf32>
    %308 = arith.addf %305, %307 : vector<2x128xf32>
    %c0_151 = arith.constant 0 : index
    %c0_152 = arith.constant 0 : index
    %309 = vector.load %arg11[%c0_151, %c0_152] : memref<2x32xf32, #tpu.memory_space<vmem>>, vector<2x32xf32>
    %310 = vector.extract_strided_slice %308 {offsets = [0, 0], sizes = [2, 96], strides = [1, 1]} : vector<2x128xf32> to vector<2x96xf32>
    %311 = arith.negf %310 : vector<2x96xf32>
    %312 = math.exp %311 : vector<2x96xf32>
    %cst_153 = arith.constant 1.000000e+00 : f32
    %313 = vector.broadcast %cst_153 : f32 to vector<2x96xf32>
    %314 = arith.addf %313, %312 : vector<2x96xf32>
    %315 = arith.divf %313, %314 : vector<2x96xf32>
    %316 = vector.extract_strided_slice %308 {offsets = [0, 96], sizes = [2, 32], strides = [1, 1]} : vector<2x128xf32> to vector<2x32xf32>
    %317 = math.tanh %316 : vector<2x32xf32>
    %318 = vector.extract_strided_slice %315 {offsets = [0, 0], sizes = [2, 32], strides = [1, 1]} : vector<2x96xf32> to vector<2x32xf32>
    %319 = vector.extract_strided_slice %315 {offsets = [0, 32], sizes = [2, 32], strides = [1, 1]} : vector<2x96xf32> to vector<2x32xf32>
    %320 = vector.extract_strided_slice %315 {offsets = [0, 64], sizes = [2, 32], strides = [1, 1]} : vector<2x96xf32> to vector<2x32xf32>
    %321 = arith.mulf %319, %309 : vector<2x32xf32>
    %322 = arith.mulf %318, %317 : vector<2x32xf32>
    %323 = arith.addf %321, %322 : vector<2x32xf32>
    %324 = math.tanh %323 : vector<2x32xf32>
    %325 = arith.mulf %320, %324 : vector<2x32xf32>
    %c0_154 = arith.constant 0 : index
    %c0_155 = arith.constant 0 : index
    %326 = vector.load %arg9[%c0_154, %c0_155] : memref<2x32xf32, #tpu.memory_space<vmem>>, vector<2x32xf32>
    tpu.vector_store %arg9[%c0_154, %c0_155], %325 {strides = array<i32>} : memref<2x32xf32, #tpu.memory_space<vmem>>, vector<2x32xf32>,
    %c0_156 = arith.constant 0 : index
    %c0_157 = arith.constant 0 : index
    %327 = vector.load %arg11[%c0_156, %c0_157] : memref<2x32xf32, #tpu.memory_space<vmem>>, vector<2x32xf32>
    tpu.vector_store %arg11[%c0_156, %c0_157], %323 {strides = array<i32>} : memref<2x32xf32, #tpu.memory_space<vmem>>, vector<2x32xf32>,
    %cst_158 = arith.constant dense<0.000000e+00> : vector<2x128xf32>
    %328 = tpu.matmul %325, %5, %cst_158 {dimension_numbers = #tpu.dot_dimension_numbers<[1], [0], [0], [1], [0, 0, 1, 1], [], []>} : vector<2x32xf32>, vector<32x128xf32>, vector<2x128xf32> -> vector<2x128xf32>
    %c0_159 = arith.constant 0 : index
    %c0_160 = arith.constant 0 : index
    %329 = vector.load %arg10[%c0_159, %c0_160] : memref<2x32xf32, #tpu.memory_space<vmem>>, vector<2x32xf32>
    %cst_161 = arith.constant dense<0.000000e+00> : vector<2x128xf32>
    %330 = tpu.matmul %329, %4, %cst_161 {dimension_numbers = #tpu.dot_dimension_numbers<[1], [0], [0], [1], [0, 0, 1, 1], [], []>} : vector<2x32xf32>, vector<32x128xf32>, vector<2x128xf32> -> vector<2x128xf32>
    %331 = arith.addf %328, %330 : vector<2x128xf32>
    %332 = arith.addf %331, %8 : vector<2x128xf32>
    %c0_162 = arith.constant 0 : index
    %c0_163 = arith.constant 0 : index
    %333 = vector.load %arg12[%c0_162, %c0_163] : memref<2x32xf32, #tpu.memory_space<vmem>>, vector<2x32xf32>
    %334 = vector.extract_strided_slice %332 {offsets = [0, 0], sizes = [2, 96], strides = [1, 1]} : vector<2x128xf32> to vector<2x96xf32>
    %335 = arith.negf %334 : vector<2x96xf32>
    %336 = math.exp %335 : vector<2x96xf32>
    %cst_164 = arith.constant 1.000000e+00 : f32
    %337 = vector.broadcast %cst_164 : f32 to vector<2x96xf32>
    %338 = arith.addf %337, %336 : vector<2x96xf32>
    %339 = arith.divf %337, %338 : vector<2x96xf32>
    %340 = vector.extract_strided_slice %332 {offsets = [0, 96], sizes = [2, 32], strides = [1, 1]} : vector<2x128xf32> to vector<2x32xf32>
    %341 = math.tanh %340 : vector<2x32xf32>
    %342 = vector.extract_strided_slice %339 {offsets = [0, 0], sizes = [2, 32], strides = [1, 1]} : vector<2x96xf32> to vector<2x32xf32>
    %343 = vector.extract_strided_slice %339 {offsets = [0, 32], sizes = [2, 32], strides = [1, 1]} : vector<2x96xf32> to vector<2x32xf32>
    %344 = vector.extract_strided_slice %339 {offsets = [0, 64], sizes = [2, 32], strides = [1, 1]} : vector<2x96xf32> to vector<2x32xf32>
    %345 = arith.mulf %343, %333 : vector<2x32xf32>
    %346 = arith.mulf %342, %341 : vector<2x32xf32>
    %347 = arith.addf %345, %346 : vector<2x32xf32>
    %348 = math.tanh %347 : vector<2x32xf32>
    %349 = arith.mulf %344, %348 : vector<2x32xf32>
    %c0_165 = arith.constant 0 : index
    %c0_166 = arith.constant 0 : index
    %350 = vector.load %arg10[%c0_165, %c0_166] : memref<2x32xf32, #tpu.memory_space<vmem>>, vector<2x32xf32>
    tpu.vector_store %arg10[%c0_165, %c0_166], %349 {strides = array<i32>} : memref<2x32xf32, #tpu.memory_space<vmem>>, vector<2x32xf32>,
    %c0_167 = arith.constant 0 : index
    %c0_168 = arith.constant 0 : index
    %351 = vector.load %arg12[%c0_167, %c0_168] : memref<2x32xf32, #tpu.memory_space<vmem>>, vector<2x32xf32>
    tpu.vector_store %arg12[%c0_167, %c0_168], %347 {strides = array<i32>} : memref<2x32xf32, #tpu.memory_space<vmem>>, vector<2x32xf32>,
    %c7_i32 = arith.constant 7 : i32
    %352 = arith.index_cast %c7_i32 : i32 to index
    %c0_169 = arith.constant 0 : index
    %c0_170 = arith.constant 0 : index
    %353 = vector.load %arg2[%352, %c0_169, %c0_170] : memref<8x2x128xf32, #tpu.memory_space<vmem>>, vector<1x2x128xf32>
    %354 = vector.shape_cast %353 : vector<1x2x128xf32> to vector<2x128xf32>
    %c0_171 = arith.constant 0 : index
    %c0_172 = arith.constant 0 : index
    %355 = vector.load %arg9[%c0_171, %c0_172] : memref<2x32xf32, #tpu.memory_space<vmem>>, vector<2x32xf32>
    %cst_173 = arith.constant dense<0.000000e+00> : vector<2x128xf32>
    %356 = tpu.matmul %355, %3, %cst_173 {dimension_numbers = #tpu.dot_dimension_numbers<[1], [0], [0], [1], [0, 0, 1, 1], [], []>} : vector<2x32xf32>, vector<32x128xf32>, vector<2x128xf32> -> vector<2x128xf32>
    %357 = arith.addf %354, %356 : vector<2x128xf32>
    %c0_174 = arith.constant 0 : index
    %c0_175 = arith.constant 0 : index
    %358 = vector.load %arg11[%c0_174, %c0_175] : memref<2x32xf32, #tpu.memory_space<vmem>>, vector<2x32xf32>
    %359 = vector.extract_strided_slice %357 {offsets = [0, 0], sizes = [2, 96], strides = [1, 1]} : vector<2x128xf32> to vector<2x96xf32>
    %360 = arith.negf %359 : vector<2x96xf32>
    %361 = math.exp %360 : vector<2x96xf32>
    %cst_176 = arith.constant 1.000000e+00 : f32
    %362 = vector.broadcast %cst_176 : f32 to vector<2x96xf32>
    %363 = arith.addf %362, %361 : vector<2x96xf32>
    %364 = arith.divf %362, %363 : vector<2x96xf32>
    %365 = vector.extract_strided_slice %357 {offsets = [0, 96], sizes = [2, 32], strides = [1, 1]} : vector<2x128xf32> to vector<2x32xf32>
    %366 = math.tanh %365 : vector<2x32xf32>
    %367 = vector.extract_strided_slice %364 {offsets = [0, 0], sizes = [2, 32], strides = [1, 1]} : vector<2x96xf32> to vector<2x32xf32>
    %368 = vector.extract_strided_slice %364 {offsets = [0, 32], sizes = [2, 32], strides = [1, 1]} : vector<2x96xf32> to vector<2x32xf32>
    %369 = vector.extract_strided_slice %364 {offsets = [0, 64], sizes = [2, 32], strides = [1, 1]} : vector<2x96xf32> to vector<2x32xf32>
    %370 = arith.mulf %368, %358 : vector<2x32xf32>
    %371 = arith.mulf %367, %366 : vector<2x32xf32>
    %372 = arith.addf %370, %371 : vector<2x32xf32>
    %373 = math.tanh %372 : vector<2x32xf32>
    %374 = arith.mulf %369, %373 : vector<2x32xf32>
    %c0_177 = arith.constant 0 : index
    %c0_178 = arith.constant 0 : index
    %375 = vector.load %arg9[%c0_177, %c0_178] : memref<2x32xf32, #tpu.memory_space<vmem>>, vector<2x32xf32>
    tpu.vector_store %arg9[%c0_177, %c0_178], %374 {strides = array<i32>} : memref<2x32xf32, #tpu.memory_space<vmem>>, vector<2x32xf32>,
    %c0_179 = arith.constant 0 : index
    %c0_180 = arith.constant 0 : index
    %376 = vector.load %arg11[%c0_179, %c0_180] : memref<2x32xf32, #tpu.memory_space<vmem>>, vector<2x32xf32>
    tpu.vector_store %arg11[%c0_179, %c0_180], %372 {strides = array<i32>} : memref<2x32xf32, #tpu.memory_space<vmem>>, vector<2x32xf32>,
    %cst_181 = arith.constant dense<0.000000e+00> : vector<2x128xf32>
    %377 = tpu.matmul %374, %5, %cst_181 {dimension_numbers = #tpu.dot_dimension_numbers<[1], [0], [0], [1], [0, 0, 1, 1], [], []>} : vector<2x32xf32>, vector<32x128xf32>, vector<2x128xf32> -> vector<2x128xf32>
    %c0_182 = arith.constant 0 : index
    %c0_183 = arith.constant 0 : index
    %378 = vector.load %arg10[%c0_182, %c0_183] : memref<2x32xf32, #tpu.memory_space<vmem>>, vector<2x32xf32>
    %cst_184 = arith.constant dense<0.000000e+00> : vector<2x128xf32>
    %379 = tpu.matmul %378, %4, %cst_184 {dimension_numbers = #tpu.dot_dimension_numbers<[1], [0], [0], [1], [0, 0, 1, 1], [], []>} : vector<2x32xf32>, vector<32x128xf32>, vector<2x128xf32> -> vector<2x128xf32>
    %380 = arith.addf %377, %379 : vector<2x128xf32>
    %381 = arith.addf %380, %8 : vector<2x128xf32>
    %c0_185 = arith.constant 0 : index
    %c0_186 = arith.constant 0 : index
    %382 = vector.load %arg12[%c0_185, %c0_186] : memref<2x32xf32, #tpu.memory_space<vmem>>, vector<2x32xf32>
    %383 = vector.extract_strided_slice %381 {offsets = [0, 0], sizes = [2, 96], strides = [1, 1]} : vector<2x128xf32> to vector<2x96xf32>
    %384 = arith.negf %383 : vector<2x96xf32>
    %385 = math.exp %384 : vector<2x96xf32>
    %cst_187 = arith.constant 1.000000e+00 : f32
    %386 = vector.broadcast %cst_187 : f32 to vector<2x96xf32>
    %387 = arith.addf %386, %385 : vector<2x96xf32>
    %388 = arith.divf %386, %387 : vector<2x96xf32>
    %389 = vector.extract_strided_slice %381 {offsets = [0, 96], sizes = [2, 32], strides = [1, 1]} : vector<2x128xf32> to vector<2x32xf32>
    %390 = math.tanh %389 : vector<2x32xf32>
    %391 = vector.extract_strided_slice %388 {offsets = [0, 0], sizes = [2, 32], strides = [1, 1]} : vector<2x96xf32> to vector<2x32xf32>
    %392 = vector.extract_strided_slice %388 {offsets = [0, 32], sizes = [2, 32], strides = [1, 1]} : vector<2x96xf32> to vector<2x32xf32>
    %393 = vector.extract_strided_slice %388 {offsets = [0, 64], sizes = [2, 32], strides = [1, 1]} : vector<2x96xf32> to vector<2x32xf32>
    %394 = arith.mulf %392, %382 : vector<2x32xf32>
    %395 = arith.mulf %391, %390 : vector<2x32xf32>
    %396 = arith.addf %394, %395 : vector<2x32xf32>
    %397 = math.tanh %396 : vector<2x32xf32>
    %398 = arith.mulf %393, %397 : vector<2x32xf32>
    %c0_188 = arith.constant 0 : index
    %c0_189 = arith.constant 0 : index
    %399 = vector.load %arg10[%c0_188, %c0_189] : memref<2x32xf32, #tpu.memory_space<vmem>>, vector<2x32xf32>
    tpu.vector_store %arg10[%c0_188, %c0_189], %398 {strides = array<i32>} : memref<2x32xf32, #tpu.memory_space<vmem>>, vector<2x32xf32>,
    %c0_190 = arith.constant 0 : index
    %c0_191 = arith.constant 0 : index
    %400 = vector.load %arg12[%c0_190, %c0_191] : memref<2x32xf32, #tpu.memory_space<vmem>>, vector<2x32xf32>
    tpu.vector_store %arg12[%c0_190, %c0_191], %396 {strides = array<i32>} : memref<2x32xf32, #tpu.memory_space<vmem>>, vector<2x32xf32>,
    %c8_i32 = arith.constant 8 : i32
    %c0_i32_192 = arith.constant 0 : i32
    %401 = arith.cmpi eq, %arg1, %c0_i32_192 : i32
    %402 = arith.extui %401 : i1 to i32
    %c0_i32_193 = arith.constant 0 : i32
    %403 = arith.cmpi ne, %402, %c0_i32_193 : i32
    scf.if %403 {
      %c0_194 = arith.constant 0 : index
      %c0_195 = arith.constant 0 : index
      %404 = vector.load %arg9[%c0_194, %c0_195] : memref<2x32xf32, #tpu.memory_space<vmem>>, vector<2x32xf32>
      %c0_196 = arith.constant 0 : index
      %c0_197 = arith.constant 0 : index
      %c0_198 = arith.constant 0 : index
      %405 = vector.load %arg7[%c0_196, %c0_197, %c0_198] : memref<2x2x32xf32, #tpu.memory_space<vmem>>, vector<1x2x32xf32>
      %406 = vector.shape_cast %405 : vector<1x2x32xf32> to vector<2x32xf32>
      %407 = vector.shape_cast %404 : vector<2x32xf32> to vector<1x2x32xf32>
      tpu.vector_store %arg7[%c0_196, %c0_197, %c0_198], %407 {strides = array<i32>} : memref<2x2x32xf32, #tpu.memory_space<vmem>>, vector<1x2x32xf32>,
      %c0_199 = arith.constant 0 : index
      %c0_200 = arith.constant 0 : index
      %408 = vector.load %arg11[%c0_199, %c0_200] : memref<2x32xf32, #tpu.memory_space<vmem>>, vector<2x32xf32>
      %c0_201 = arith.constant 0 : index
      %c0_202 = arith.constant 0 : index
      %c0_203 = arith.constant 0 : index
      %409 = vector.load %arg8[%c0_201, %c0_202, %c0_203] : memref<2x2x32xf32, #tpu.memory_space<vmem>>, vector<1x2x32xf32>
      %410 = vector.shape_cast %409 : vector<1x2x32xf32> to vector<2x32xf32>
      %411 = vector.shape_cast %408 : vector<2x32xf32> to vector<1x2x32xf32>
      tpu.vector_store %arg8[%c0_201, %c0_202, %c0_203], %411 {strides = array<i32>} : memref<2x2x32xf32, #tpu.memory_space<vmem>>, vector<1x2x32xf32>,
      %c0_204 = arith.constant 0 : index
      %c0_205 = arith.constant 0 : index
      %412 = vector.load %arg10[%c0_204, %c0_205] : memref<2x32xf32, #tpu.memory_space<vmem>>, vector<2x32xf32>
      %c1 = arith.constant 1 : index
      %c0_206 = arith.constant 0 : index
      %c0_207 = arith.constant 0 : index
      %413 = vector.load %arg7[%c1, %c0_206, %c0_207] : memref<2x2x32xf32, #tpu.memory_space<vmem>>, vector<1x2x32xf32>
      %414 = vector.shape_cast %413 : vector<1x2x32xf32> to vector<2x32xf32>
      %415 = vector.shape_cast %412 : vector<2x32xf32> to vector<1x2x32xf32>
      tpu.vector_store %arg7[%c1, %c0_206, %c0_207], %415 {strides = array<i32>} : memref<2x2x32xf32, #tpu.memory_space<vmem>>, vector<1x2x32xf32>,
      %c0_208 = arith.constant 0 : index
      %c0_209 = arith.constant 0 : index
      %416 = vector.load %arg12[%c0_208, %c0_209] : memref<2x32xf32, #tpu.memory_space<vmem>>, vector<2x32xf32>
      %c1_210 = arith.constant 1 : index
      %c0_211 = arith.constant 0 : index
      %c0_212 = arith.constant 0 : index
      %417 = vector.load %arg8[%c1_210, %c0_211, %c0_212] : memref<2x2x32xf32, #tpu.memory_space<vmem>>, vector<1x2x32xf32>
      %418 = vector.shape_cast %417 : vector<1x2x32xf32> to vector<2x32xf32>
      %419 = vector.shape_cast %416 : vector<2x32xf32> to vector<1x2x32xf32>
      tpu.vector_store %arg8[%c1_210, %c0_211, %c0_212], %419 {strides = array<i32>} : memref<2x2x32xf32, #tpu.memory_space<vmem>>, vector<1x2x32xf32>,
    } else {
    }
    return
  }
  func.func @transform_0(%arg0: i32, %arg1: i32) -> (i32, i32, i32) {
    %c0_i32 = arith.constant 0 : i32
    %c0_i32_0 = arith.constant 0 : i32
    return %arg1, %arg0, %c0_i32 : i32, i32, i32
  }
  func.func @transform_1(%arg0: i32, %arg1: i32) -> (i32, i32) {
    %c0_i32 = arith.constant 0 : i32
    %c0_i32_0 = arith.constant 0 : i32
    %c0_i32_1 = arith.constant 0 : i32
    return %c0_i32, %c0_i32_0 : i32, i32
  }
  func.func @transform_2(%arg0: i32, %arg1: i32) -> (i32, i32) {
    %c0_i32 = arith.constant 0 : i32
    %c0_i32_0 = arith.constant 0 : i32
    %c0_i32_1 = arith.constant 0 : i32
    return %c0_i32, %c0_i32_0 : i32, i32
  }
  func.func @transform_3(%arg0: i32, %arg1: i32) -> (i32, i32) {
    %c0_i32 = arith.constant 0 : i32
    %c0_i32_0 = arith.constant 0 : i32
    %c0_i32_1 = arith.constant 0 : i32
    return %c0_i32, %c0_i32_0 : i32, i32
  }
  func.func @transform_4(%arg0: i32, %arg1: i32) -> (i32, i32) {
    %c0_i32 = arith.constant 0 : i32
    %c0_i32_0 = arith.constant 0 : i32
    %c0_i32_1 = arith.constant 0 : i32
    return %c0_i32, %c0_i32_0 : i32, i32
  }
  func.func @transform_5(%arg0: i32, %arg1: i32) -> (i32, i32, i32) {
    %c0_i32 = arith.constant 0 : i32
    %c0_i32_0 = arith.constant 0 : i32
    %c0_i32_1 = arith.constant 0 : i32
    return %c0_i32, %arg0, %c0_i32_0 : i32, i32, i32
  }
  func.func @transform_6(%arg0: i32, %arg1: i32) -> (i32, i32, i32) {
    %c0_i32 = arith.constant 0 : i32
    %c0_i32_0 = arith.constant 0 : i32
    %c0_i32_1 = arith.constant 0 : i32
    return %c0_i32, %arg0, %c0_i32_0 : i32, i32, i32
  }
}

</mosaic_0001>

<bundles_post_ra>
// kernel: encoder_forward.1
= control target key start
LH: loop header
LB: loop body
LE: loop exit
PB: predicated region body
PF: predicated region fallthrough
CT: control target
= control target key end

     0   :  { %12 = vsyncpa [#allocation7], 0  ;;  %vm28_vm0 = vcmask 254976   ;;  %v3139_v1 = vmov 0.0   ;;  %vm3140_vm1 = vmmov 0   ;;  %s3758_s0 = inlined_call_operand.vmem [shape: f32[8,2,128], index: 0, kind: input, shape index: {}]   ;;  %s3759_s1 = inlined_call_operand.vmem [shape: f32[32,128], index: 1, kind: input, shape index: {}]   ;;  %s3760_s2 = inlined_call_operand.vmem [shape: f32[32,128], index: 2, kind: input, shape index: {}]   ;;  %s3761_s3 = inlined_call_operand.vmem [shape: f32[32,128], index: 3, kind: input, shape index: {}]   ;;  %s3762_s4 = inlined_call_operand.vmem [shape: f32[1,128], index: 4, kind: input, shape index: {}]   ;;  %s3763_s5 = inlined_call_operand.hbm [shape: f32[2,2,32], index: 5, kind: output, shape index: {0}]   ;;  %s3764_s6 = inlined_call_operand.hbm [shape: f32[2,2,32], index: 6, kind: output, shape index: {1}]  }
   0x1   :  { %v3185_v0 = vld [vmem:[%s3759_s1 + $0x18] sm:$0xff]  ;;  %2682 = vmatprep.subr.mxu0 %v3139_v1  ;;  %v3191_v2 = vld [vmem:[%s3759_s1 + $0x10] sm:$0xff]  ;;  %2690 = vmatprep.mubr.msk.f32.mxu0 %vm3140_vm1, %v3139_v1  ;;  %29 = vst.msk [vmem:[#allocation2] sm:$0x3] %vm28_vm0, %v3139_v1  ;;  %30 = vst.msk [vmem:[#allocation4] sm:$0x3] %vm28_vm0, %v3139_v1 }
   0x2   :  { %31 = vst.msk [vmem:[#allocation3] sm:$0x3] %vm28_vm0, %v3139_v1  ;;  %32 = vst.msk [vmem:[#allocation5] sm:$0x3] %vm28_vm0, %v3139_v1 }
   0x3   :  { %13 = vsyncpa [#allocation9], 0  ;;  %2683 = vmatpush3.msra.mxu0 %v3185_v0  ;;  %2693 = vmatprep.subr.mxu1 %v3139_v1  ;;  %v3209_v3 = vld [vmem:[%s3759_s1 + $0x8] sm:$0xff]  ;;  %v3218_v4 = vld [vmem:[%s3759_s1] sm:$0xff]  ;;  %vm54_vm2 = vcmask 261120   ;;  %s3141_s7 = smov 32  }
   0x4   :  { %2684 = vmatprep.subr.mxu0 %v3139_v1  ;;  %2701 = vmatprep.mubr.msk.f32.mxu1 %vm3140_vm1, %v3139_v1  ;;  %v52_v6 = vld [vmem:[%s3758_s0] sm:$0x3]  ;;  %v3236_v22 = vld [vmem:[%s3761_s3 + $0x18] sm:$0xff]  ;;  %v3241_v23 = vld [vmem:[%s3761_s3 + $0x10] sm:$0xff]  ;;  %s3142_s24 = smov 96   ;;  %s3143_s25 = smov 64  }
   0x5   :  { %2685 = vmatpush3.msra.mxu0 %v3191_v2  ;;  %v3246_v24 = vld [vmem:[%s3760_s2 + $0x18] sm:$0xff]  ;;  %2694 = vmatpush3.msra.mxu1 %v3236_v22  ;;  %v3253_v25 = vld [vmem:[%s3760_s2 + $0x10] sm:$0xff]  ;;  %v3260_v26 = vld [vmem:[%s3761_s3 + $0x8] sm:$0xff] }
   0x6   :  { %2686 = vmatprep.subr.mxu0 %v3139_v1  ;;  %2695 = vmatprep.subr.mxu1 %v3139_v1  ;;  %v3265_v27 = vld [vmem:[%s3760_s2 + $0x8] sm:$0xff]  ;;  %v3274_v28 = vld [vmem:[%s3761_s3] sm:$0xff] }
   0x7   :  { %2687 = vmatpush3.msra.mxu0 %v3209_v3  ;;  %2696 = vmatpush3.msra.mxu1 %v3241_v23  ;;  %v3279_v29 = vld [vmem:[%s3760_s2] sm:$0xff] }
   0x8   :  { %2688 = vmatprep.subr.mxu0 %v3139_v1  ;;  %v53_v5 = vld [vmem:[#allocation2] sm:$0x3]  ;;  %v129_v11 = vld [vmem:[#allocation4] sm:$0x3]  ;;  %2697 = vmatprep.subr.mxu1 %v3139_v1  ;;  %v2520_v44 = vld [vmem:[%s3758_s0 + $0x2] sm:$0x3] }
   0x9   :  { %2689 = vmatpush3.msra.mxu0 %v3218_v4  ;;  %2698 = vmatpush3.msra.mxu1 %v3260_v26  ;;  %v169_v30 = vld [vmem:[#allocation3] sm:$0x3]  ;;  %v3330_v39 = vld [vmem:[%s3762_s4] ss:$0 sm:$0xff]  ;;  %v316_v49 = vld [vmem:[#allocation5] sm:$0x3] }
   0xa   :  { %2691 = vmatmul.mubr.msk.f32.vlgmr.msra.gmra.mxu0 %vm54_vm2, %v53_v5  ;;  %2704 = vmatprep.subr.mxu0 %v3139_v1 }
   0xb   :  { %2712 = vmatprep.mubr.msk.f32.mxu0 %vm3140_vm1, %v3139_v1  ;;  %2705 = vmatpush3.msra.mxu0 %v3246_v24 }
   0xc   :  { %2706 = vmatprep.subr.mxu0 %v3139_v1  ;;  %2699 = vmatprep.subr.mxu1 %v3139_v1 }
   0xd   :  { %2707 = vmatpush3.msra.mxu0 %v3253_v25  ;;  %2700 = vmatpush3.msra.mxu1 %v3274_v28 }
   0xe   :  { %2708 = vmatprep.subr.mxu0 %v3139_v1  ;;  %2702 = vmatmul.mubr.msk.f32.vlgmr.msra.gmra.mxu1 %vm54_vm2, %v169_v30 }
   0xf   :  { %2709 = vmatpush3.msra.mxu0 %v3265_v27  ;;  %2715 = vmatprep.subr.mxu1 %v3139_v1 }
  0x10   :  { %2710 = vmatprep.subr.mxu0 %v3139_v1  ;;  %2716 = vmatpush3.msra.mxu1 %v3185_v0 }
  0x11   :  { %2711 = vmatpush3.msra.mxu0 %v3279_v29  ;;  %2717 = vmatprep.subr.mxu1 %v3139_v1 }
  0x12   :  { %2723 = vmatprep.mubr.msk.f32.mxu1 %vm3140_vm1, %v3139_v1  ;;  %2718 = vmatpush3.msra.mxu1 %v3191_v2 }
  0x13   :  { %2726 = vmatprep.subr.mxu0 %v3139_v1  ;;  %2719 = vmatprep.subr.mxu1 %v3139_v1 }
  0x14   :  { %2720 = vmatpush3.msra.mxu1 %v3209_v3 }
  0x15   :  { %2721 = vmatprep.subr.mxu1 %v3139_v1 }
  0x16   :  { %2722 = vmatpush3.msra.mxu1 %v3218_v4 }
  0x17   :  { %2737 = vmatprep.subr.mxu1 %v3139_v1 }
  0xca   :  { %v124_v7 = vpop.f32.mrf.mxu0 }
  0xcb   :  { %v128_v8 = vadd.f32 %v124_v7, %v52_v6 }
  0xcc   :  { %v2692_v9 = vpop.f32.mrf.mxu0 }
  0xcd   :  { %2954 = vtanh.f32 %v128_v8  ;;  %v2516_v12 = vmul.f32 -1.442695, %v128_v8 }
  0xce   :  { %v239_v35 = vpop.f32.mrf.mxu1 }
  0xcf   :  { %2956 = vpow2.f32 %v2516_v12 }
  0xd0   :  { %v2703_v36 = vpop.f32.mrf.mxu1 }
  0xda   :  { %v2955_v10 = vpop.eup %2954 }
  0xdb   :  { %143 = vrot.lane.b32.xlu0 %v2955_v10, %s3141_s7 }
  0xdc   :  { %v2957_v13 = vpop.eup %2956 }
  0xdd   :  { %v133_v14 = vadd.f32 1.0, %v2957_v13 }
  0xdf   :  { %138 = vrot.lane.b32.xlu0 %v129_v11, %s3141_s7  ;;  %2958 = vrcp.f32 %v133_v14 }
  0xec   :  { %v2959_v15 = vpop.eup %2958 }
 0x14d   :  { %v144_v16 = vpop.permute.xlu0 %143 }
 0x14e   :  { %v146_v17 = vmul.f32 %v2959_v15, %v144_v16 }
 0x150   :  { %148 = vrot.lane.b32.xlu1 %v146_v17, %s3141_s7 }
 0x151   :  { %v139_v18 = vpop.permute.xlu0 %138 }
 0x152   :  { %v141_v19 = vmul.f32 %v2959_v15, %v139_v18 }
 0x1c2   :  { %v149_v20 = vpop.permute.xlu1 %148 }
 0x1c3   :  { %v151_v21 = vadd.f32 %v149_v20, %v141_v19 }
 0x1c5   :  { %2960 = vtanh.f32 %v151_v21 }
 0x1d2   :  { %v2961_v31 = vpop.eup %2960 }
 0x1d3   :  { %154 = vrot.lane.b32.xlu1 %v2961_v31, %s3141_s7 }
 0x1d7   :  { %165 = vrot.lane.b32.xlu1 %v151_v21, %s3142_s24 }
 0x245   :  { %v155_v32 = vpop.permute.xlu1 %154 }
 0x246   :  { %v157_v33 = vmul.f32 %v2959_v15, %v155_v32 }
 0x248   :  { %159 = vrot.lane.b32.xlu0 %v157_v33, %s3143_s25 }
 0x249   :  { %v166_v34 = vpop.permute.xlu1 %165 }
 0x24a   :  { %168 = vst.msk [vmem:[#allocation4] sm:$0x3] %vm28_vm0, %v166_v34 }
 0x251   :  { %v432_v51 = vld [vmem:[#allocation4] sm:$0x3] }
 0x2ba   :  { %v160_v37 = vpop.permute.xlu0 %159 }
 0x2bb   :  { %163 = vst.msk [vmem:[#allocation2] sm:$0x3] %vm28_vm0, %v160_v37  ;;  %2713 = vmatmul.mubr.msk.f32.vlgmr.msra.gmra.mxu0 %vm54_vm2, %v160_v37 }
 0x2bc   :  { %2727 = vmatpush3.msra.mxu0 %v3236_v22  ;;  %2734 = vmatprep.mubr.msk.f32.mxu0 %vm3140_vm1, %v3139_v1 }
 0x2bd   :  { %2728 = vmatprep.subr.mxu0 %v3139_v1 }
 0x2be   :  { %2729 = vmatpush3.msra.mxu0 %v3241_v23 }
 0x2bf   :  { %2730 = vmatprep.subr.mxu0 %v3139_v1 }
 0x2c0   :  { %2731 = vmatpush3.msra.mxu0 %v3260_v26 }
 0x2c1   :  { %2732 = vmatprep.subr.mxu0 %v3139_v1 }
 0x2c2   :  { %v357_v38 = vld [vmem:[#allocation2] sm:$0x3]  ;;  %2733 = vmatpush3.msra.mxu0 %v3274_v28 }
 0x2c3   :  { %2724 = vmatmul.mubr.msk.f32.vlgmr.msra.gmra.mxu1 %vm54_vm2, %v357_v38  ;;  %2748 = vmatprep.subr.mxu0 %v3139_v1 }
 0x2c4   :  { %2738 = vmatpush3.msra.mxu1 %v3246_v24  ;;  %2745 = vmatprep.mubr.msk.f32.mxu1 %vm3140_vm1, %v3139_v1 }
 0x2c5   :  { %2739 = vmatprep.subr.mxu1 %v3139_v1 }
 0x2c6   :  { %2740 = vmatpush3.msra.mxu1 %v3253_v25 }
 0x2c7   :  { %2741 = vmatprep.subr.mxu1 %v3139_v1 }
 0x2c8   :  { %2742 = vmatpush3.msra.mxu1 %v3265_v27 }
 0x2c9   :  { %2743 = vmatprep.subr.mxu1 %v3139_v1 }
 0x2ca   :  { %2744 = vmatpush3.msra.mxu1 %v3279_v29 }
 0x2cb   :  { %2759 = vmatprep.subr.mxu1 %v3139_v1 }
 0x37b   :  { %v311_v40 = vpop.f32.mrf.mxu0 }
 0x37c   :  { %v312_v41 = vadd.f32 %v311_v40, %v239_v35  ;;  %v2526_v40 = vld [vmem:[%s3758_s0 + $0x4] sm:$0x3] }
 0x37d   :  { %v2714_v42 = vpop.f32.mrf.mxu0 }
 0x37e   :  { %v315_v43 = vadd.f32 %v3330_v39, %v312_v41 }
 0x380   :  { %2962 = vtanh.f32 %v315_v43  ;;  %v2519_v52 = vmul.f32 -1.442695, %v315_v43 }
 0x383   :  { %v427_v45 = vpop.f32.mrf.mxu1 }
 0x384   :  { %v431_v46 = vadd.f32 %v2520_v44, %v427_v45 }
 0x385   :  { %v2725_v47 = vpop.f32.mrf.mxu1 }
 0x386   :  { %2964 = vtanh.f32 %v431_v46  ;;  %v2522_v53 = vmul.f32 -1.442695, %v431_v46 }
 0x387   :  { %2966 = vpow2.f32 %v2519_v52 }
 0x388   :  { %2968 = vpow2.f32 %v2522_v53 }
 0x38d   :  { %v2963_v48 = vpop.eup %2962 }
 0x38e   :  { %330 = vrot.lane.b32.xlu0 %v2963_v48, %s3141_s7 }
 0x392   :  { %325 = vrot.lane.b32.xlu0 %v316_v49, %s3141_s7 }
 0x393   :  { %v2965_v50 = vpop.eup %2964 }
 0x394   :  { %446 = vrot.lane.b32.xlu1 %v2965_v50, %s3141_s7  ;;  %v2967_v54 = vpop.eup %2966 }
 0x395   :  { %v320_v55 = vadd.f32 1.0, %v2967_v54  ;;  %v2969_v56 = vpop.eup %2968 }
 0x396   :  { %441 = vrot.lane.b32.xlu0 %v432_v51, %s3141_s7  ;;  %v436_v57 = vadd.f32 1.0, %v2969_v56 }
 0x397   :  { %2970 = vrcp.f32 %v320_v55 }
 0x398   :  { %2972 = vrcp.f32 %v436_v57 }
 0x3a4   :  { %v2971_v58 = vpop.eup %2970 }
 0x3a5   :  { %v2973_v61 = vpop.eup %2972 }
 0x400   :  { %v331_v59 = vpop.permute.xlu0 %330 }
 0x401   :  { %v333_v60 = vmul.f32 %v2971_v58, %v331_v59 }
 0x403   :  { %335 = vrot.lane.b32.xlu1 %v333_v60, %s3141_s7 }
 0x404   :  { %v326_v5 = vpop.permute.xlu0 %325 }
 0x405   :  { %v328_v6 = vmul.f32 %v2971_v58, %v326_v5 }
 0x406   :  { %v447_v62 = vpop.permute.xlu1 %446 }
 0x407   :  { %v449_v63 = vmul.f32 %v2973_v61, %v447_v62 }
 0x408   :  { %v442_v9 = vpop.permute.xlu0 %441 }
 0x409   :  { %451 = vrot.lane.b32.xlu1 %v449_v63, %s3141_s7  ;;  %v444_v10 = vmul.f32 %v2973_v61, %v442_v9 }
 0x475   :  { %v336_v7 = vpop.permute.xlu1 %335 }
 0x476   :  { %v338_v8 = vadd.f32 %v336_v7, %v328_v6 }
 0x478   :  { %2974 = vtanh.f32 %v338_v8 }
 0x47b   :  { %v452_v11 = vpop.permute.xlu1 %451 }
 0x47c   :  { %v454_v12 = vadd.f32 %v452_v11, %v444_v10 }
 0x47e   :  { %2976 = vtanh.f32 %v454_v12 }
 0x485   :  { %v2975_v13 = vpop.eup %2974 }
 0x486   :  { %341 = vrot.lane.b32.xlu0 %v2975_v13, %s3141_s7 }
 0x48b   :  { %v2977_v14 = vpop.eup %2976 }
 0x48c   :  { %457 = vrot.lane.b32.xlu1 %v2977_v14, %s3141_s7 }
 0x4f8   :  { %v342_v15 = vpop.permute.xlu0 %341 }
 0x4f9   :  { %v344_v16 = vmul.f32 %v2971_v58, %v342_v15 }
 0x4fb   :  { %346 = vrot.lane.b32.xlu0 %v344_v16, %s3143_s25 }
 0x4fe   :  { %v458_v17 = vpop.permute.xlu1 %457 }
 0x4ff   :  { %v460_v18 = vmul.f32 %v2973_v61, %v458_v17  ;;  %351 = vrot.lane.b32.xlu0 %v338_v8, %s3142_s24 }
 0x501   :  { %462 = vrot.lane.b32.xlu1 %v460_v18, %s3143_s25 }
 0x505   :  { %467 = vrot.lane.b32.xlu1 %v454_v12, %s3142_s24 }
 0x56d   :  { %v347_v19 = vpop.permute.xlu0 %346 }
 0x56e   :  { %349 = vst.msk [vmem:[#allocation3] sm:$0x3] %vm28_vm0, %v347_v19 }
 0x571   :  { %v352_v20 = vpop.permute.xlu0 %351 }
 0x572   :  { %354 = vst.msk [vmem:[#allocation5] sm:$0x3] %vm28_vm0, %v352_v20 }
 0x573   :  { %v463_v21 = vpop.permute.xlu1 %462 }
 0x574   :  { %465 = vst.msk [vmem:[#allocation2] sm:$0x3] %vm28_vm0, %v463_v21  ;;  %2746 = vmatmul.mubr.msk.f32.vlgmr.msra.gmra.mxu1 %vm54_vm2, %v463_v21 }
 0x575   :  { %v471_v30 = vld [vmem:[#allocation3] sm:$0x3]  ;;  %2760 = vmatpush3.msra.mxu1 %v3236_v22  ;;  %2767 = vmatprep.mubr.msk.f32.mxu1 %vm3140_vm1, %v3139_v1 }
 0x576   :  { %2735 = vmatmul.mubr.msk.f32.vlgmr.msra.gmra.mxu0 %vm54_vm2, %v471_v30  ;;  %2761 = vmatprep.subr.mxu1 %v3139_v1 }
 0x577   :  { %2749 = vmatpush3.msra.mxu0 %v3185_v0  ;;  %v468_v31 = vpop.permute.xlu1 %467  ;;  %2756 = vmatprep.mubr.msk.f32.mxu0 %vm3140_vm1, %v3139_v1 }
 0x578   :  { %470 = vst.msk [vmem:[#allocation4] sm:$0x3] %vm28_vm0, %v468_v31  ;;  %2750 = vmatprep.subr.mxu0 %v3139_v1  ;;  %2762 = vmatpush3.msra.mxu1 %v3241_v23 }
 0x579   :  { %2751 = vmatpush3.msra.mxu0 %v3191_v2  ;;  %2763 = vmatprep.subr.mxu1 %v3139_v1  ;;  %v618_v45 = vld [vmem:[#allocation5] sm:$0x3] }
 0x57a   :  { %2752 = vmatprep.subr.mxu0 %v3139_v1  ;;  %2764 = vmatpush3.msra.mxu1 %v3260_v26 }
 0x57b   :  { %2753 = vmatpush3.msra.mxu0 %v3209_v3  ;;  %v659_v32 = vld [vmem:[#allocation2] sm:$0x3]  ;;  %2765 = vmatprep.subr.mxu1 %v3139_v1 }
 0x57c   :  { %2754 = vmatprep.subr.mxu0 %v3139_v1  ;;  %2766 = vmatpush3.msra.mxu1 %v3274_v28 }
 0x57d   :  { %2755 = vmatpush3.msra.mxu0 %v3218_v4  ;;  %2781 = vmatprep.subr.mxu1 %v3139_v1 }
 0x57e   :  { %2757 = vmatmul.mubr.msk.f32.vlgmr.msra.gmra.mxu0 %vm54_vm2, %v659_v32  ;;  %2770 = vmatprep.subr.mxu0 %v3139_v1 }
 0x57f   :  { %2771 = vmatpush3.msra.mxu0 %v3246_v24  ;;  %2778 = vmatprep.mubr.msk.f32.mxu0 %vm3140_vm1, %v3139_v1  ;;  %v734_v47 = vld [vmem:[#allocation4] sm:$0x3] }
 0x580   :  { %2772 = vmatprep.subr.mxu0 %v3139_v1 }
 0x581   :  { %2773 = vmatpush3.msra.mxu0 %v3253_v25 }
 0x582   :  { %2774 = vmatprep.subr.mxu0 %v3139_v1 }
 0x583   :  { %2775 = vmatpush3.msra.mxu0 %v3265_v27 }
 0x584   :  { %2776 = vmatprep.subr.mxu0 %v3139_v1 }
 0x585   :  { %2777 = vmatpush3.msra.mxu0 %v3279_v29 }
 0x586   :  { %2792 = vmatprep.subr.mxu0 %v3139_v1 }
 0x634   :  { %v613_v33 = vpop.f32.mrf.mxu1 }
 0x636   :  { %v541_v34 = vpop.f32.mrf.mxu0  ;;  %v2747_v35 = vpop.f32.mrf.mxu1 }
 0x637   :  { %v614_v36 = vadd.f32 %v613_v33, %v541_v34  ;;  %v2532_v35 = vld [vmem:[%s3758_s0 + $0x6] sm:$0x3] }
 0x638   :  { %v2736_v37 = vpop.f32.mrf.mxu0 }
 0x639   :  { %v617_v38 = vadd.f32 %v3330_v39, %v614_v36 }
 0x63b   :  { %2978 = vtanh.f32 %v617_v38  ;;  %v2525_v48 = vmul.f32 -1.442695, %v617_v38 }
 0x63e   :  { %v729_v41 = vpop.f32.mrf.mxu0 }
 0x63f   :  { %v733_v42 = vadd.f32 %v2526_v40, %v729_v41 }
 0x640   :  { %v2758_v43 = vpop.f32.mrf.mxu0 }
 0x641   :  { %2980 = vtanh.f32 %v733_v42  ;;  %v2528_v49 = vmul.f32 -1.442695, %v733_v42 }
 0x642   :  { %2982 = vpow2.f32 %v2525_v48 }
 0x643   :  { %2984 = vpow2.f32 %v2528_v49 }
 0x648   :  { %v2979_v44 = vpop.eup %2978 }
 0x649   :  { %632 = vrot.lane.b32.xlu0 %v2979_v44, %s3141_s7 }
 0x64d   :  { %627 = vrot.lane.b32.xlu0 %v618_v45, %s3141_s7 }
 0x64e   :  { %v2981_v46 = vpop.eup %2980 }
 0x64f   :  { %748 = vrot.lane.b32.xlu1 %v2981_v46, %s3141_s7  ;;  %v2983_v50 = vpop.eup %2982 }
 0x650   :  { %v622_v51 = vadd.f32 1.0, %v2983_v50  ;;  %v2985_v52 = vpop.eup %2984 }
 0x651   :  { %743 = vrot.lane.b32.xlu0 %v734_v47, %s3141_s7  ;;  %v738_v53 = vadd.f32 1.0, %v2985_v52 }
 0x652   :  { %2986 = vrcp.f32 %v622_v51 }
 0x653   :  { %2988 = vrcp.f32 %v738_v53 }
 0x65f   :  { %v2987_v54 = vpop.eup %2986 }
 0x660   :  { %v2989_v57 = vpop.eup %2988 }
 0x6bb   :  { %v633_v55 = vpop.permute.xlu0 %632 }
 0x6bc   :  { %v635_v56 = vmul.f32 %v2987_v54, %v633_v55 }
 0x6be   :  { %637 = vrot.lane.b32.xlu1 %v635_v56, %s3141_s7 }
 0x6bf   :  { %v628_v60 = vpop.permute.xlu0 %627 }
 0x6c0   :  { %v630_v61 = vmul.f32 %v2987_v54, %v628_v60 }
 0x6c1   :  { %v749_v58 = vpop.permute.xlu1 %748 }
 0x6c2   :  { %v751_v59 = vmul.f32 %v2989_v57, %v749_v58 }
 0x6c3   :  { %v744_v5 = vpop.permute.xlu0 %743 }
 0x6c4   :  { %753 = vrot.lane.b32.xlu1 %v751_v59, %s3141_s7  ;;  %v746_v6 = vmul.f32 %v2989_v57, %v744_v5 }
 0x730   :  { %v638_v62 = vpop.permute.xlu1 %637 }
 0x731   :  { %v640_v63 = vadd.f32 %v638_v62, %v630_v61 }
 0x733   :  { %2990 = vtanh.f32 %v640_v63 }
 0x736   :  { %v754_v7 = vpop.permute.xlu1 %753 }
 0x737   :  { %v756_v8 = vadd.f32 %v754_v7, %v746_v6 }
 0x739   :  { %2992 = vtanh.f32 %v756_v8 }
 0x740   :  { %v2991_v9 = vpop.eup %2990 }
 0x741   :  { %643 = vrot.lane.b32.xlu0 %v2991_v9, %s3141_s7 }
 0x746   :  { %v2993_v10 = vpop.eup %2992 }
 0x747   :  { %759 = vrot.lane.b32.xlu1 %v2993_v10, %s3141_s7 }
 0x7b3   :  { %v644_v11 = vpop.permute.xlu0 %643 }
 0x7b4   :  { %v646_v12 = vmul.f32 %v2987_v54, %v644_v11 }
 0x7b6   :  { %648 = vrot.lane.b32.xlu0 %v646_v12, %s3143_s25 }
 0x7b9   :  { %v760_v13 = vpop.permute.xlu1 %759 }
 0x7ba   :  { %v762_v14 = vmul.f32 %v2989_v57, %v760_v13  ;;  %653 = vrot.lane.b32.xlu0 %v640_v63, %s3142_s24 }
 0x7bc   :  { %764 = vrot.lane.b32.xlu1 %v762_v14, %s3143_s25 }
 0x7c0   :  { %769 = vrot.lane.b32.xlu1 %v756_v8, %s3142_s24 }
 0x828   :  { %v649_v15 = vpop.permute.xlu0 %648 }
 0x829   :  { %651 = vst.msk [vmem:[#allocation3] sm:$0x3] %vm28_vm0, %v649_v15 }
 0x82c   :  { %v654_v16 = vpop.permute.xlu0 %653 }
 0x82d   :  { %656 = vst.msk [vmem:[#allocation5] sm:$0x3] %vm28_vm0, %v654_v16 }
 0x82e   :  { %v765_v17 = vpop.permute.xlu1 %764 }
 0x82f   :  { %767 = vst.msk [vmem:[#allocation2] sm:$0x3] %vm28_vm0, %v765_v17  ;;  %2779 = vmatmul.mubr.msk.f32.vlgmr.msra.gmra.mxu0 %vm54_vm2, %v765_v17 }
 0x830   :  { %v773_v18 = vld [vmem:[#allocation3] sm:$0x3]  ;;  %2793 = vmatpush3.msra.mxu0 %v3236_v22  ;;  %2800 = vmatprep.mubr.msk.f32.mxu0 %vm3140_vm1, %v3139_v1 }
 0x831   :  { %2768 = vmatmul.mubr.msk.f32.vlgmr.msra.gmra.mxu1 %vm54_vm2, %v773_v18  ;;  %2794 = vmatprep.subr.mxu0 %v3139_v1 }
 0x832   :  { %2782 = vmatpush3.msra.mxu1 %v3185_v0  ;;  %v770_v19 = vpop.permute.xlu1 %769  ;;  %2789 = vmatprep.mubr.msk.f32.mxu1 %vm3140_vm1, %v3139_v1 }
 0x833   :  { %772 = vst.msk [vmem:[#allocation4] sm:$0x3] %vm28_vm0, %v770_v19  ;;  %2783 = vmatprep.subr.mxu1 %v3139_v1  ;;  %2795 = vmatpush3.msra.mxu0 %v3241_v23 }
 0x834   :  { %2784 = vmatpush3.msra.mxu1 %v3191_v2  ;;  %2796 = vmatprep.subr.mxu0 %v3139_v1  ;;  %v920_v41 = vld [vmem:[#allocation5] sm:$0x3] }
 0x835   :  { %2785 = vmatprep.subr.mxu1 %v3139_v1  ;;  %2797 = vmatpush3.msra.mxu0 %v3260_v26 }
 0x836   :  { %2786 = vmatpush3.msra.mxu1 %v3209_v3  ;;  %2798 = vmatprep.subr.mxu0 %v3139_v1  ;;  %v961_v20 = vld [vmem:[#allocation2] sm:$0x3] }
 0x837   :  { %2787 = vmatprep.subr.mxu1 %v3139_v1  ;;  %2799 = vmatpush3.msra.mxu0 %v3274_v28 }
 0x838   :  { %2788 = vmatpush3.msra.mxu1 %v3218_v4  ;;  %2814 = vmatprep.subr.mxu0 %v3139_v1 }
 0x839   :  { %2790 = vmatmul.mubr.msk.f32.vlgmr.msra.gmra.mxu1 %vm54_vm2, %v961_v20  ;;  %2803 = vmatprep.subr.mxu1 %v3139_v1 }
 0x83a   :  { %2804 = vmatpush3.msra.mxu1 %v3246_v24  ;;  %2811 = vmatprep.mubr.msk.f32.mxu1 %vm3140_vm1, %v3139_v1  ;;  %v1036_v43 = vld [vmem:[#allocation4] sm:$0x3] }
 0x83b   :  { %2805 = vmatprep.subr.mxu1 %v3139_v1 }
 0x83c   :  { %2806 = vmatpush3.msra.mxu1 %v3253_v25 }
 0x83d   :  { %2807 = vmatprep.subr.mxu1 %v3139_v1 }
 0x83e   :  { %2808 = vmatpush3.msra.mxu1 %v3265_v27 }
 0x83f   :  { %2809 = vmatprep.subr.mxu1 %v3139_v1 }
 0x840   :  { %2810 = vmatpush3.msra.mxu1 %v3279_v29 }
 0x841   :  { %2825 = vmatprep.subr.mxu1 %v3139_v1 }
 0x8ef   :  { %v915_v21 = vpop.f32.mrf.mxu0 }
 0x8f1   :  { %v2780_v30 = vpop.f32.mrf.mxu0  ;;  %v843_v31 = vpop.f32.mrf.mxu1 }
 0x8f2   :  { %v916_v32 = vadd.f32 %v915_v21, %v843_v31  ;;  %v2538_v31 = vld [vmem:[%s3758_s0 + $0x8] sm:$0x3] }
 0x8f3   :  { %v2769_v33 = vpop.f32.mrf.mxu1 }
 0x8f4   :  { %v919_v34 = vadd.f32 %v3330_v39, %v916_v32 }
 0x8f6   :  { %2994 = vtanh.f32 %v919_v34  ;;  %v2531_v44 = vmul.f32 -1.442695, %v919_v34 }
 0x8f9   :  { %v1031_v36 = vpop.f32.mrf.mxu1 }
 0x8fa   :  { %v1035_v37 = vadd.f32 %v2532_v35, %v1031_v36 }
 0x8fb   :  { %v2791_v38 = vpop.f32.mrf.mxu1 }
 0x8fc   :  { %2996 = vtanh.f32 %v1035_v37  ;;  %v2534_v45 = vmul.f32 -1.442695, %v1035_v37 }
 0x8fd   :  { %2998 = vpow2.f32 %v2531_v44 }
 0x8fe   :  { %3000 = vpow2.f32 %v2534_v45 }
 0x903   :  { %v2995_v40 = vpop.eup %2994 }
 0x904   :  { %934 = vrot.lane.b32.xlu0 %v2995_v40, %s3141_s7 }
 0x908   :  { %929 = vrot.lane.b32.xlu0 %v920_v41, %s3141_s7 }
 0x909   :  { %v2997_v42 = vpop.eup %2996 }
 0x90a   :  { %1050 = vrot.lane.b32.xlu1 %v2997_v42, %s3141_s7  ;;  %v2999_v46 = vpop.eup %2998 }
 0x90b   :  { %v924_v47 = vadd.f32 1.0, %v2999_v46  ;;  %v3001_v48 = vpop.eup %3000 }
 0x90c   :  { %1045 = vrot.lane.b32.xlu0 %v1036_v43, %s3141_s7  ;;  %v1040_v49 = vadd.f32 1.0, %v3001_v48 }
 0x90d   :  { %3002 = vrcp.f32 %v924_v47 }
 0x90e   :  { %3004 = vrcp.f32 %v1040_v49 }
 0x91a   :  { %v3003_v50 = vpop.eup %3002 }
 0x91b   :  { %v3005_v53 = vpop.eup %3004 }
 0x976   :  { %v935_v51 = vpop.permute.xlu0 %934 }
 0x977   :  { %v937_v52 = vmul.f32 %v3003_v50, %v935_v51 }
 0x979   :  { %939 = vrot.lane.b32.xlu1 %v937_v52, %s3141_s7 }
 0x97a   :  { %v930_v56 = vpop.permute.xlu0 %929 }
 0x97b   :  { %v932_v57 = vmul.f32 %v3003_v50, %v930_v56 }
 0x97c   :  { %v1051_v54 = vpop.permute.xlu1 %1050 }
 0x97d   :  { %v1053_v55 = vmul.f32 %v3005_v53, %v1051_v54 }
 0x97e   :  { %v1046_v60 = vpop.permute.xlu0 %1045 }
 0x97f   :  { %1055 = vrot.lane.b32.xlu1 %v1053_v55, %s3141_s7  ;;  %v1048_v61 = vmul.f32 %v3005_v53, %v1046_v60 }
 0x9eb   :  { %v940_v58 = vpop.permute.xlu1 %939 }
 0x9ec   :  { %v942_v59 = vadd.f32 %v940_v58, %v932_v57 }
 0x9ee   :  { %3006 = vtanh.f32 %v942_v59 }
 0x9f1   :  { %v1056_v62 = vpop.permute.xlu1 %1055 }
 0x9f2   :  { %v1058_v63 = vadd.f32 %v1056_v62, %v1048_v61 }
 0x9f4   :  { %3008 = vtanh.f32 %v1058_v63 }
 0x9fb   :  { %v3007_v5 = vpop.eup %3006 }
 0x9fc   :  { %945 = vrot.lane.b32.xlu0 %v3007_v5, %s3141_s7 }
 0xa01   :  { %v3009_v6 = vpop.eup %3008 }
 0xa02   :  { %1061 = vrot.lane.b32.xlu1 %v3009_v6, %s3141_s7 }
 0xa6e   :  { %v946_v7 = vpop.permute.xlu0 %945 }
 0xa6f   :  { %v948_v8 = vmul.f32 %v3003_v50, %v946_v7 }
 0xa71   :  { %950 = vrot.lane.b32.xlu0 %v948_v8, %s3143_s25 }
 0xa74   :  { %v1062_v9 = vpop.permute.xlu1 %1061 }
 0xa75   :  { %v1064_v10 = vmul.f32 %v3005_v53, %v1062_v9  ;;  %955 = vrot.lane.b32.xlu0 %v942_v59, %s3142_s24 }
 0xa77   :  { %1066 = vrot.lane.b32.xlu1 %v1064_v10, %s3143_s25 }
 0xa7b   :  { %1071 = vrot.lane.b32.xlu1 %v1058_v63, %s3142_s24 }
 0xae3   :  { %v951_v11 = vpop.permute.xlu0 %950 }
 0xae4   :  { %953 = vst.msk [vmem:[#allocation3] sm:$0x3] %vm28_vm0, %v951_v11 }
 0xae7   :  { %v956_v12 = vpop.permute.xlu0 %955 }
 0xae8   :  { %958 = vst.msk [vmem:[#allocation5] sm:$0x3] %vm28_vm0, %v956_v12 }
 0xae9   :  { %v1067_v13 = vpop.permute.xlu1 %1066 }
 0xaea   :  { %1069 = vst.msk [vmem:[#allocation2] sm:$0x3] %vm28_vm0, %v1067_v13  ;;  %2812 = vmatmul.mubr.msk.f32.vlgmr.msra.gmra.mxu1 %vm54_vm2, %v1067_v13 }
 0xaeb   :  { %v1075_v14 = vld [vmem:[#allocation3] sm:$0x3]  ;;  %2826 = vmatpush3.msra.mxu1 %v3236_v22  ;;  %2833 = vmatprep.mubr.msk.f32.mxu1 %vm3140_vm1, %v3139_v1 }
 0xaec   :  { %2801 = vmatmul.mubr.msk.f32.vlgmr.msra.gmra.mxu0 %vm54_vm2, %v1075_v14  ;;  %2827 = vmatprep.subr.mxu1 %v3139_v1 }
 0xaed   :  { %v1072_v15 = vpop.permute.xlu1 %1071  ;;  %2815 = vmatpush3.msra.mxu0 %v3185_v0  ;;  %2822 = vmatprep.mubr.msk.f32.mxu0 %vm3140_vm1, %v3139_v1 }
 0xaee   :  { %1074 = vst.msk [vmem:[#allocation4] sm:$0x3] %vm28_vm0, %v1072_v15  ;;  %2816 = vmatprep.subr.mxu0 %v3139_v1  ;;  %2828 = vmatpush3.msra.mxu1 %v3241_v23 }
 0xaef   :  { %2817 = vmatpush3.msra.mxu0 %v3191_v2  ;;  %2829 = vmatprep.subr.mxu1 %v3139_v1  ;;  %v1222_v36 = vld [vmem:[#allocation5] sm:$0x3] }
 0xaf0   :  { %2818 = vmatprep.subr.mxu0 %v3139_v1  ;;  %2830 = vmatpush3.msra.mxu1 %v3260_v26 }
 0xaf1   :  { %2819 = vmatpush3.msra.mxu0 %v3209_v3  ;;  %2831 = vmatprep.subr.mxu1 %v3139_v1  ;;  %v1263_v16 = vld [vmem:[#allocation2] sm:$0x3] }
 0xaf2   :  { %2820 = vmatprep.subr.mxu0 %v3139_v1  ;;  %2832 = vmatpush3.msra.mxu1 %v3274_v28 }
 0xaf3   :  { %2821 = vmatpush3.msra.mxu0 %v3218_v4  ;;  %2847 = vmatprep.subr.mxu1 %v3139_v1 }
 0xaf4   :  { %2823 = vmatmul.mubr.msk.f32.vlgmr.msra.gmra.mxu0 %vm54_vm2, %v1263_v16  ;;  %2836 = vmatprep.subr.mxu0 %v3139_v1 }
 0xaf5   :  { %2837 = vmatpush3.msra.mxu0 %v3246_v24  ;;  %2844 = vmatprep.mubr.msk.f32.mxu0 %vm3140_vm1, %v3139_v1  ;;  %v1338_v38 = vld [vmem:[#allocation4] sm:$0x3] }
 0xaf6   :  { %2838 = vmatprep.subr.mxu0 %v3139_v1 }
 0xaf7   :  { %2839 = vmatpush3.msra.mxu0 %v3253_v25 }
 0xaf8   :  { %2840 = vmatprep.subr.mxu0 %v3139_v1 }
 0xaf9   :  { %2841 = vmatpush3.msra.mxu0 %v3265_v27 }
 0xafa   :  { %2842 = vmatprep.subr.mxu0 %v3139_v1 }
 0xafb   :  { %2843 = vmatpush3.msra.mxu0 %v3279_v29 }
 0xafc   :  { %2858 = vmatprep.subr.mxu0 %v3139_v1 }
 0xbaa   :  { %v1217_v17 = vpop.f32.mrf.mxu1 }
 0xbac   :  { %v2813_v18 = vpop.f32.mrf.mxu1  ;;  %v1145_v19 = vpop.f32.mrf.mxu0 }
 0xbad   :  { %v1218_v20 = vadd.f32 %v1217_v17, %v1145_v19 }
 0xbae   :  { %v2802_v21 = vpop.f32.mrf.mxu0 }
 0xbaf   :  { %v1221_v30 = vadd.f32 %v3330_v39, %v1218_v20 }
 0xbb1   :  { %3010 = vtanh.f32 %v1221_v30  ;;  %v2537_v40 = vmul.f32 -1.442695, %v1221_v30 }
 0xbb4   :  { %v1333_v32 = vpop.f32.mrf.mxu0 }
 0xbb5   :  { %v1337_v33 = vadd.f32 %v2538_v31, %v1333_v32 }
 0xbb6   :  { %v2824_v34 = vpop.f32.mrf.mxu0 }
 0xbb7   :  { %3012 = vtanh.f32 %v1337_v33  ;;  %v2540_v41 = vmul.f32 -1.442695, %v1337_v33 }
 0xbb8   :  { %3014 = vpow2.f32 %v2537_v40 }
 0xbb9   :  { %3016 = vpow2.f32 %v2540_v41 }
 0xbbe   :  { %v3011_v35 = vpop.eup %3010 }
 0xbbf   :  { %1236 = vrot.lane.b32.xlu0 %v3011_v35, %s3141_s7 }
 0xbc3   :  { %1231 = vrot.lane.b32.xlu0 %v1222_v36, %s3141_s7 }
 0xbc4   :  { %v3013_v37 = vpop.eup %3012 }
 0xbc5   :  { %1352 = vrot.lane.b32.xlu1 %v3013_v37, %s3141_s7  ;;  %v3015_v42 = vpop.eup %3014 }
 0xbc6   :  { %v1226_v43 = vadd.f32 1.0, %v3015_v42  ;;  %v3017_v44 = vpop.eup %3016 }
 0xbc7   :  { %1347 = vrot.lane.b32.xlu0 %v1338_v38, %s3141_s7  ;;  %v1342_v45 = vadd.f32 1.0, %v3017_v44 }
 0xbc8   :  { %3018 = vrcp.f32 %v1226_v43 }
 0xbc9   :  { %3020 = vrcp.f32 %v1342_v45 }
 0xbd5   :  { %v3019_v46 = vpop.eup %3018 }
 0xbd6   :  { %v3021_v49 = vpop.eup %3020 }
 0xc31   :  { %v1237_v47 = vpop.permute.xlu0 %1236 }
 0xc32   :  { %v1239_v48 = vmul.f32 %v3019_v46, %v1237_v47 }
 0xc34   :  { %1241 = vrot.lane.b32.xlu1 %v1239_v48, %s3141_s7 }
 0xc35   :  { %v1232_v52 = vpop.permute.xlu0 %1231 }
 0xc36   :  { %v1234_v53 = vmul.f32 %v3019_v46, %v1232_v52 }
 0xc37   :  { %v1353_v50 = vpop.permute.xlu1 %1352 }
 0xc38   :  { %v1355_v51 = vmul.f32 %v3021_v49, %v1353_v50 }
 0xc39   :  { %v1348_v56 = vpop.permute.xlu0 %1347 }
 0xc3a   :  { %1357 = vrot.lane.b32.xlu1 %v1355_v51, %s3141_s7  ;;  %v1350_v57 = vmul.f32 %v3021_v49, %v1348_v56  ;;  %v3577_v56 = vld [vmem:[%s3759_s1 + $0x18] sm:$0xff] }
 0xca6   :  { %v1242_v54 = vpop.permute.xlu1 %1241 }
 0xca7   :  { %v1244_v55 = vadd.f32 %v1242_v54, %v1234_v53  ;;  %v3567_v54 = vld [vmem:[%s3761_s3 + $0x18] sm:$0xff] }
 0xca9   :  { %3022 = vtanh.f32 %v1244_v55 }
 0xcac   :  { %v1358_v58 = vpop.permute.xlu1 %1357 }
 0xcad   :  { %v1360_v59 = vadd.f32 %v1358_v58, %v1350_v57  ;;  %v3587_v57 = vld [vmem:[%s3761_s3 + $0x10] sm:$0xff] }
 0xcae   :  { %v3593_v58 = vld [vmem:[%s3759_s1 + $0x10] sm:$0xff] }
 0xcaf   :  { %3024 = vtanh.f32 %v1360_v59 }
 0xcb6   :  { %v3023_v60 = vpop.eup %3022 }
 0xcb7   :  { %1247 = vrot.lane.b32.xlu0 %v3023_v60, %s3141_s7  ;;  %v3607_v60 = vld [vmem:[%s3759_s1 + $0x8] sm:$0xff] }
 0xcbc   :  { %v3025_v61 = vpop.eup %3024 }
 0xcbd   :  { %1363 = vrot.lane.b32.xlu1 %v3025_v61, %s3141_s7  ;;  %v3615_v61 = vld [vmem:[%s3761_s3] sm:$0xff] }
 0xd29   :  { %v1248_v62 = vpop.permute.xlu0 %1247 }
 0xd2a   :  { %v1250_v63 = vmul.f32 %v3019_v46, %v1248_v62  ;;  %v3621_v62 = vld [vmem:[%s3759_s1] sm:$0xff] }
 0xd2c   :  { %1252 = vrot.lane.b32.xlu0 %v1250_v63, %s3143_s25 }
 0xd2f   :  { %v1364_v5 = vpop.permute.xlu1 %1363 }
 0xd30   :  { %v1366_v6 = vmul.f32 %v3021_v49, %v1364_v5  ;;  %1257 = vrot.lane.b32.xlu0 %v1244_v55, %s3142_s24  ;;  %v3630_v5 = vld [vmem:[%s3760_s2 + $0x18] sm:$0xff] }
 0xd32   :  { %1368 = vrot.lane.b32.xlu1 %v1366_v6, %s3143_s25  ;;  %v3639_v6 = vld [vmem:[%s3760_s2 + $0x10] sm:$0xff] }
 0xd36   :  { %1373 = vrot.lane.b32.xlu1 %v1360_v59, %s3142_s24  ;;  %v3601_v59 = vld [vmem:[%s3761_s3 + $0x8] sm:$0xff] }
 0xd9e   :  { %v1253_v7 = vpop.permute.xlu0 %1252 }
 0xd9f   :  { %1255 = vst.msk [vmem:[#allocation3] sm:$0x3] %vm28_vm0, %v1253_v7  ;;  %v3646_v7 = vld [vmem:[%s3760_s2 + $0x8] sm:$0xff] }
 0xda2   :  { %v1258_v8 = vpop.permute.xlu0 %1257 }
 0xda3   :  { %1260 = vst.msk [vmem:[#allocation5] sm:$0x3] %vm28_vm0, %v1258_v8  ;;  %v3653_v8 = vld [vmem:[%s3760_s2] sm:$0xff] }
 0xda4   :  { %v1369_v9 = vpop.permute.xlu1 %1368 }
 0xda5   :  { %1371 = vst.msk [vmem:[#allocation2] sm:$0x3] %vm28_vm0, %v1369_v9  ;;  %2845 = vmatmul.mubr.msk.f32.vlgmr.msra.gmra.mxu0 %vm54_vm2, %v1369_v9 }
 0xda6   :  { %v1377_v10 = vld [vmem:[#allocation3] sm:$0x3]  ;;  %2859 = vmatpush3.msra.mxu0 %v3236_v22  ;;  %2866 = vmatprep.mubr.msk.f32.mxu0 %vm3140_vm1, %v3139_v1 }
 0xda7   :  { %2834 = vmatmul.mubr.msk.f32.vlgmr.msra.gmra.mxu1 %vm54_vm2, %v1377_v10  ;;  %2860 = vmatprep.subr.mxu0 %v3139_v1 }
 0xda8   :  { %2848 = vmatpush3.msra.mxu1 %v3185_v0  ;;  %v1374_v11 = vpop.permute.xlu1 %1373  ;;  %2855 = vmatprep.mubr.msk.f32.mxu1 %vm3140_vm1, %v3139_v1 }
 0xda9   :  { %1376 = vst.msk [vmem:[#allocation4] sm:$0x3] %vm28_vm0, %v1374_v11  ;;  %2849 = vmatprep.subr.mxu1 %v3139_v1  ;;  %2861 = vmatpush3.msra.mxu0 %v3241_v23 }
 0xdaa   :  { %2850 = vmatpush3.msra.mxu1 %v3191_v2  ;;  %2862 = vmatprep.subr.mxu0 %v3139_v1 }
 0xdab   :  { %2851 = vmatprep.subr.mxu1 %v3139_v1  ;;  %2863 = vmatpush3.msra.mxu0 %v3260_v26 }
 0xdac   :  { %2852 = vmatpush3.msra.mxu1 %v3209_v3  ;;  %2864 = vmatprep.subr.mxu0 %v3139_v1  ;;  %v1565_v0 = vld [vmem:[#allocation2] sm:$0x3] }
 0xdad   :  { %2853 = vmatprep.subr.mxu1 %v3139_v1  ;;  %2865 = vmatpush3.msra.mxu0 %v3274_v28 }
 0xdae   :  { %2854 = vmatpush3.msra.mxu1 %v3218_v4  ;;  %2880 = vmatprep.subr.mxu0 %v3139_v1 }
 0xdaf   :  { %2856 = vmatmul.mubr.msk.f32.vlgmr.msra.gmra.mxu1 %vm54_vm2, %v1565_v0  ;;  %2869 = vmatprep.subr.mxu1 %v3139_v1 }
 0xdb0   :  { %2870 = vmatpush3.msra.mxu1 %v3246_v24  ;;  %2877 = vmatprep.mubr.msk.f32.mxu1 %vm3140_vm1, %v3139_v1  ;;  %v1640_v14 = vld [vmem:[#allocation4] sm:$0x3] }
 0xdb1   :  { %2871 = vmatprep.subr.mxu1 %v3139_v1 }
 0xdb2   :  { %2872 = vmatpush3.msra.mxu1 %v3253_v25  ;;  %v2544_v25 = vld [vmem:[%s3758_s0 + $0xa] sm:$0x3] }
 0xdb3   :  { %2873 = vmatprep.subr.mxu1 %v3139_v1 }
 0xdb4   :  { %2874 = vmatpush3.msra.mxu1 %v3265_v27 }
 0xdb5   :  { %2875 = vmatprep.subr.mxu1 %v3139_v1 }
 0xdb6   :  { %2876 = vmatpush3.msra.mxu1 %v3279_v29  ;;  %v1524_v29 = vld [vmem:[#allocation5] sm:$0x3] }
 0xdb7   :  { %2891 = vmatprep.subr.mxu1 %v3139_v1 }
 0xe65   :  { %v1519_v2 = vpop.f32.mrf.mxu0 }
 0xe67   :  { %v2846_v3 = vpop.f32.mrf.mxu0  ;;  %v1447_v4 = vpop.f32.mrf.mxu1 }
 0xe68   :  { %v1520_v22 = vadd.f32 %v1519_v2, %v1447_v4  ;;  %v2550_v4 = vld [vmem:[%s3758_s0 + $0xc] sm:$0x3] }
 0xe69   :  { %v2835_v23 = vpop.f32.mrf.mxu1 }
 0xe6a   :  { %v1523_v24 = vadd.f32 %v3330_v39, %v1520_v22 }
 0xe6c   :  { %3026 = vtanh.f32 %v1523_v24  ;;  %v2543_v15 = vmul.f32 -1.442695, %v1523_v24 }
 0xe6f   :  { %v1635_v26 = vpop.f32.mrf.mxu1 }
 0xe70   :  { %v1639_v27 = vadd.f32 %v2544_v25, %v1635_v26 }
 0xe71   :  { %v2857_v28 = vpop.f32.mrf.mxu1 }
 0xe72   :  { %3028 = vtanh.f32 %v1639_v27  ;;  %v2546_v16 = vmul.f32 -1.442695, %v1639_v27 }
 0xe73   :  { %3030 = vpow2.f32 %v2543_v15 }
 0xe74   :  { %3032 = vpow2.f32 %v2546_v16 }
 0xe79   :  { %v3027_v12 = vpop.eup %3026 }
 0xe7a   :  { %1538 = vrot.lane.b32.xlu0 %v3027_v12, %s3141_s7 }
 0xe7e   :  { %1533 = vrot.lane.b32.xlu0 %v1524_v29, %s3141_s7 }
 0xe7f   :  { %v3029_v13 = vpop.eup %3028 }
 0xe80   :  { %1654 = vrot.lane.b32.xlu1 %v3029_v13, %s3141_s7  ;;  %v3031_v17 = vpop.eup %3030 }
 0xe81   :  { %v1528_v18 = vadd.f32 1.0, %v3031_v17  ;;  %v3033_v19 = vpop.eup %3032 }
 0xe82   :  { %1649 = vrot.lane.b32.xlu0 %v1640_v14, %s3141_s7  ;;  %v1644_v20 = vadd.f32 1.0, %v3033_v19 }
 0xe83   :  { %3034 = vrcp.f32 %v1528_v18 }
 0xe84   :  { %3036 = vrcp.f32 %v1644_v20 }
 0xe90   :  { %v3035_v21 = vpop.eup %3034 }
 0xe91   :  { %v3037_v32 = vpop.eup %3036 }
 0xeec   :  { %v1539_v30 = vpop.permute.xlu0 %1538 }
 0xeed   :  { %v1541_v31 = vmul.f32 %v3035_v21, %v1539_v30 }
 0xeef   :  { %1543 = vrot.lane.b32.xlu1 %v1541_v31, %s3141_s7 }
 0xef0   :  { %v1534_v35 = vpop.permute.xlu0 %1533 }
 0xef1   :  { %v1536_v36 = vmul.f32 %v3035_v21, %v1534_v35 }
 0xef2   :  { %v1655_v33 = vpop.permute.xlu1 %1654 }
 0xef3   :  { %v1657_v34 = vmul.f32 %v3037_v32, %v1655_v33 }
 0xef4   :  { %v1650_v40 = vpop.permute.xlu0 %1649 }
 0xef5   :  { %1659 = vrot.lane.b32.xlu1 %v1657_v34, %s3141_s7  ;;  %v1652_v41 = vmul.f32 %v3037_v32, %v1650_v40 }
 0xf61   :  { %v1544_v37 = vpop.permute.xlu1 %1543 }
 0xf62   :  { %v1546_v38 = vadd.f32 %v1544_v37, %v1536_v36 }
 0xf64   :  { %3038 = vtanh.f32 %v1546_v38 }
 0xf67   :  { %v1660_v42 = vpop.permute.xlu1 %1659 }
 0xf68   :  { %v1662_v43 = vadd.f32 %v1660_v42, %v1652_v41 }
 0xf6a   :  { %3040 = vtanh.f32 %v1662_v43 }
 0xf71   :  { %v3039_v44 = vpop.eup %3038 }
 0xf72   :  { %1549 = vrot.lane.b32.xlu0 %v3039_v44, %s3141_s7 }
 0xf77   :  { %v3041_v45 = vpop.eup %3040 }
 0xf78   :  { %1665 = vrot.lane.b32.xlu1 %v3041_v45, %s3141_s7 }
 0xfe4   :  { %v1550_v46 = vpop.permute.xlu0 %1549 }
 0xfe5   :  { %v1552_v47 = vmul.f32 %v3035_v21, %v1550_v46 }
 0xfe7   :  { %1554 = vrot.lane.b32.xlu0 %v1552_v47, %s3143_s25 }
 0xfea   :  { %v1666_v48 = vpop.permute.xlu1 %1665 }
 0xfeb   :  { %v1668_v49 = vmul.f32 %v3037_v32, %v1666_v48  ;;  %1559 = vrot.lane.b32.xlu0 %v1546_v38, %s3142_s24 }
 0xfed   :  { %1670 = vrot.lane.b32.xlu1 %v1668_v49, %s3143_s25 }
 0xff1   :  { %1675 = vrot.lane.b32.xlu1 %v1662_v43, %s3142_s24 }
0x1059   :  { %v1555_v50 = vpop.permute.xlu0 %1554 }
0x105a   :  { %1557 = vst.msk [vmem:[#allocation3] sm:$0x3] %vm28_vm0, %v1555_v50 }
0x105d   :  { %v1560_v51 = vpop.permute.xlu0 %1559 }
0x105e   :  { %1562 = vst.msk [vmem:[#allocation5] sm:$0x3] %vm28_vm0, %v1560_v51 }
0x105f   :  { %v1671_v52 = vpop.permute.xlu1 %1670 }
0x1060   :  { %1673 = vst.msk [vmem:[#allocation2] sm:$0x3] %vm28_vm0, %v1671_v52  ;;  %2878 = vmatmul.mubr.msk.f32.vlgmr.msra.gmra.mxu1 %vm54_vm2, %v1671_v52 }
0x1061   :  { %v1679_v53 = vld [vmem:[#allocation3] sm:$0x3]  ;;  %2892 = vmatpush3.msra.mxu1 %v3567_v54  ;;  %2899 = vmatprep.mubr.msk.f32.mxu1 %vm3140_vm1, %v3139_v1 }
0x1062   :  { %2867 = vmatmul.mubr.msk.f32.vlgmr.msra.gmra.mxu0 %vm54_vm2, %v1679_v53  ;;  %2893 = vmatprep.subr.mxu1 %v3139_v1 }
0x1063   :  { %v1676_v55 = vpop.permute.xlu1 %1675  ;;  %2881 = vmatpush3.msra.mxu0 %v3577_v56  ;;  %2888 = vmatprep.mubr.msk.f32.mxu0 %vm3140_vm1, %v3139_v1 }
0x1064   :  { %1678 = vst.msk [vmem:[#allocation4] sm:$0x3] %vm28_vm0, %v1676_v55  ;;  %2882 = vmatprep.subr.mxu0 %v3139_v1  ;;  %2894 = vmatpush3.msra.mxu1 %v3587_v57 }
0x1065   :  { %2883 = vmatpush3.msra.mxu0 %v3593_v58  ;;  %2895 = vmatprep.subr.mxu1 %v3139_v1  ;;  %v1826_v26 = vld [vmem:[#allocation5] sm:$0x3] }
0x1066   :  { %2884 = vmatprep.subr.mxu0 %v3139_v1  ;;  %2896 = vmatpush3.msra.mxu1 %v3601_v59 }
0x1067   :  { %2885 = vmatpush3.msra.mxu0 %v3607_v60  ;;  %2897 = vmatprep.subr.mxu1 %v3139_v1  ;;  %v1867_v63 = vld [vmem:[#allocation2] sm:$0x3] }
0x1068   :  { %2886 = vmatprep.subr.mxu0 %v3139_v1  ;;  %2898 = vmatpush3.msra.mxu1 %v3615_v61 }
0x1069   :  { %2887 = vmatpush3.msra.mxu0 %v3621_v62  ;;  %2913 = vmatprep.subr.mxu1 %v3139_v1 }
0x106a   :  { %2889 = vmatmul.mubr.msk.f32.vlgmr.msra.gmra.mxu0 %vm54_vm2, %v1867_v63  ;;  %2902 = vmatprep.subr.mxu0 %v3139_v1 }
0x106b   :  { %2903 = vmatpush3.msra.mxu0 %v3630_v5  ;;  %2910 = vmatprep.mubr.msk.f32.mxu0 %vm3140_vm1, %v3139_v1  ;;  %v1942_v28 = vld [vmem:[#allocation4] sm:$0x3] }
0x106c   :  { %2904 = vmatprep.subr.mxu0 %v3139_v1 }
0x106d   :  { %2905 = vmatpush3.msra.mxu0 %v3639_v6 }
0x106e   :  { %2906 = vmatprep.subr.mxu0 %v3139_v1 }
0x106f   :  { %2907 = vmatpush3.msra.mxu0 %v3646_v7 }
0x1070   :  { %2908 = vmatprep.subr.mxu0 %v3139_v1 }
0x1071   :  { %2909 = vmatpush3.msra.mxu0 %v3653_v8 }
0x1072   :  { %2924 = vmatprep.subr.mxu0 %v3139_v1 }
0x1120   :  { %v1821_v9 = vpop.f32.mrf.mxu1 }
0x1122   :  { %v2879_v10 = vpop.f32.mrf.mxu1  ;;  %v1749_v11 = vpop.f32.mrf.mxu0 }
0x1123   :  { %v1822_v0 = vadd.f32 %v1821_v9, %v1749_v11 }
0x1124   :  { %v2868_v2 = vpop.f32.mrf.mxu0 }
0x1125   :  { %v1825_v3 = vadd.f32 %v3330_v39, %v1822_v0 }
0x1127   :  { %3042 = vtanh.f32 %v1825_v3  ;;  %v2549_v39 = vmul.f32 -1.442695, %v1825_v3 }
0x112a   :  { %v1937_v22 = vpop.f32.mrf.mxu0 }
0x112b   :  { %v1941_v23 = vadd.f32 %v2550_v4, %v1937_v22 }
0x112c   :  { %v2890_v24 = vpop.f32.mrf.mxu0 }
0x112d   :  { %3044 = vtanh.f32 %v1941_v23  ;;  %v2552_v12 = vmul.f32 -1.442695, %v1941_v23 }
0x112e   :  { %3046 = vpow2.f32 %v2549_v39 }
0x112f   :  { %3048 = vpow2.f32 %v2552_v12 }
0x1134   :  { %v3043_v25 = vpop.eup %3042 }
0x1135   :  { %1840 = vrot.lane.b32.xlu0 %v3043_v25, %s3141_s7 }
0x1139   :  { %1835 = vrot.lane.b32.xlu0 %v1826_v26, %s3141_s7 }
0x113a   :  { %v3045_v27 = vpop.eup %3044 }
0x113b   :  { %1956 = vrot.lane.b32.xlu1 %v3045_v27, %s3141_s7  ;;  %v3047_v29 = vpop.eup %3046 }
0x113c   :  { %v1830_v13 = vadd.f32 1.0, %v3047_v29  ;;  %v3049_v14 = vpop.eup %3048 }
0x113d   :  { %1951 = vrot.lane.b32.xlu0 %v1942_v28, %s3141_s7  ;;  %v1946_v15 = vadd.f32 1.0, %v3049_v14 }
0x113e   :  { %3050 = vrcp.f32 %v1830_v13 }
0x113f   :  { %3052 = vrcp.f32 %v1946_v15 }
0x114b   :  { %v3051_v16 = vpop.eup %3050 }
0x114c   :  { %v3053_v19 = vpop.eup %3052 }
0x11a7   :  { %v1841_v17 = vpop.permute.xlu0 %1840 }
0x11a8   :  { %v1843_v18 = vmul.f32 %v3051_v16, %v1841_v17 }
0x11aa   :  { %1845 = vrot.lane.b32.xlu1 %v1843_v18, %s3141_s7 }
0x11ab   :  { %v1836_v30 = vpop.permute.xlu0 %1835 }
0x11ac   :  { %v1838_v31 = vmul.f32 %v3051_v16, %v1836_v30 }
0x11ad   :  { %v1957_v20 = vpop.permute.xlu1 %1956 }
0x11ae   :  { %v1959_v21 = vmul.f32 %v3053_v19, %v1957_v20 }
0x11af   :  { %v1952_v34 = vpop.permute.xlu0 %1951 }
0x11b0   :  { %1961 = vrot.lane.b32.xlu1 %v1959_v21, %s3141_s7  ;;  %v1954_v35 = vmul.f32 %v3053_v19, %v1952_v34 }
0x121c   :  { %v1846_v32 = vpop.permute.xlu1 %1845 }
0x121d   :  { %v1848_v33 = vadd.f32 %v1846_v32, %v1838_v31 }
0x121f   :  { %3054 = vtanh.f32 %v1848_v33 }
0x1222   :  { %v1962_v36 = vpop.permute.xlu1 %1961 }
0x1223   :  { %v1964_v37 = vadd.f32 %v1962_v36, %v1954_v35 }
0x1225   :  { %3056 = vtanh.f32 %v1964_v37 }
0x122c   :  { %v3055_v38 = vpop.eup %3054 }
0x122d   :  { %1851 = vrot.lane.b32.xlu0 %v3055_v38, %s3141_s7 }
0x1232   :  { %v3057_v40 = vpop.eup %3056 }
0x1233   :  { %1967 = vrot.lane.b32.xlu1 %v3057_v40, %s3141_s7 }
0x129f   :  { %v1852_v41 = vpop.permute.xlu0 %1851 }
0x12a0   :  { %v1854_v42 = vmul.f32 %v3051_v16, %v1852_v41 }
0x12a2   :  { %1856 = vrot.lane.b32.xlu0 %v1854_v42, %s3143_s25 }
0x12a5   :  { %v1968_v43 = vpop.permute.xlu1 %1967 }
0x12a6   :  { %v1970_v44 = vmul.f32 %v3053_v19, %v1968_v43  ;;  %1861 = vrot.lane.b32.xlu0 %v1848_v33, %s3142_s24 }
0x12a8   :  { %1972 = vrot.lane.b32.xlu1 %v1970_v44, %s3143_s25 }
0x12ac   :  { %1977 = vrot.lane.b32.xlu1 %v1964_v37, %s3142_s24 }
0x1314   :  { %v1857_v45 = vpop.permute.xlu0 %1856 }
0x1315   :  { %1859 = vst.msk [vmem:[#allocation3] sm:$0x3] %vm28_vm0, %v1857_v45 }
0x1318   :  { %v1862_v46 = vpop.permute.xlu0 %1861 }
0x1319   :  { %1864 = vst.msk [vmem:[#allocation5] sm:$0x3] %vm28_vm0, %v1862_v46 }
0x131a   :  { %v1973_v47 = vpop.permute.xlu1 %1972 }
0x131b   :  { %1975 = vst.msk [vmem:[#allocation2] sm:$0x3] %vm28_vm0, %v1973_v47  ;;  %2911 = vmatmul.mubr.msk.f32.vlgmr.msra.gmra.mxu0 %vm54_vm2, %v1973_v47 }
0x131c   :  { %v1981_v48 = vld [vmem:[#allocation3] sm:$0x3]  ;;  %2925 = vmatpush3.msra.mxu0 %v3567_v54  ;;  %2932 = vmatprep.mubr.msk.f32.mxu0 %vm3140_vm1, %v3139_v1 }
0x131d   :  { %2900 = vmatmul.mubr.msk.f32.vlgmr.msra.gmra.mxu1 %vm54_vm2, %v1981_v48  ;;  %2926 = vmatprep.subr.mxu0 %v3139_v1 }
0x131e   :  { %2914 = vmatpush3.msra.mxu1 %v3577_v56  ;;  %v1978_v49 = vpop.permute.xlu1 %1977  ;;  %2921 = vmatprep.mubr.msk.f32.mxu1 %vm3140_vm1, %v3139_v1  ;;  %v3711_v56 = vld [vmem:[%s3762_s4] ss:$0 sm:$0xff] }
0x131f   :  { %1980 = vst.msk [vmem:[#allocation4] sm:$0x3] %vm28_vm0, %v1978_v49  ;;  %2915 = vmatprep.subr.mxu1 %v3139_v1  ;;  %2927 = vmatpush3.msra.mxu0 %v3587_v57 }
0x1320   :  { %2916 = vmatpush3.msra.mxu1 %v3593_v58  ;;  %2928 = vmatprep.subr.mxu0 %v3139_v1  ;;  %v2556_v58 = vld [vmem:[%s3758_s0 + $0xe] sm:$0x3]  ;;  %s3144_s0 = smov [#allocation8]  }
0x1321   :  { %2917 = vmatprep.subr.mxu1 %v3139_v1  ;;  %2929 = vmatpush3.msra.mxu0 %v3601_v59  ;;  %s2499_s4 = sshll.u32 %s3144_s0, 4  ;;  %s2500_s4 = int_to_ptr.vmem [resolvable:$true] %s2499_s4 }
0x1322   :  { %2918 = vmatpush3.msra.mxu1 %v3607_v60  ;;  %2930 = vmatprep.subr.mxu0 %v3139_v1  ;;  %v2169_v50 = vld [vmem:[#allocation2] sm:$0x3]  ;;  %p3100_p1 = scmp.lt.s32.totalorder %s2500_s4, %s2500_s4 }
0x1323   :  { %2919 = vmatprep.subr.mxu1 %v3139_v1  ;;  %2931 = vmatpush3.msra.mxu0 %v3615_v61 }
0x1324   :  { %2920 = vmatpush3.msra.mxu1 %v3621_v62  ;;  %v2128_v62 = vld [vmem:[#allocation5] sm:$0x3] }
0x1325   :  { %2922 = vmatmul.mubr.msk.f32.vlgmr.msra.gmra.mxu1 %vm54_vm2, %v2169_v50  ;;  %2935 = vmatprep.subr.mxu1 %v3139_v1 }
0x1326   :  { %2936 = vmatpush3.msra.mxu1 %v3630_v5  ;;  %2943 = vmatprep.mubr.msk.f32.mxu1 %vm3140_vm1, %v3139_v1  ;;  %v2244_v5 = vld [vmem:[#allocation4] sm:$0x3] }
0x1327   :  { %2937 = vmatprep.subr.mxu1 %v3139_v1 }
0x1328   :  { %2938 = vmatpush3.msra.mxu1 %v3639_v6 }
0x1329   :  { %2939 = vmatprep.subr.mxu1 %v3139_v1 }
0x132a   :  { %2940 = vmatpush3.msra.mxu1 %v3646_v7 }
0x132b   :  { %2941 = vmatprep.subr.mxu1 %v3139_v1 }
0x132c   :  { %2942 = vmatpush3.msra.mxu1 %v3653_v8 }
0x13db   :  { %v2123_v51 = vpop.f32.mrf.mxu0 }
0x13dd   :  { %v2912_v52 = vpop.f32.mrf.mxu0  ;;  %v2051_v53 = vpop.f32.mrf.mxu1 }
0x13de   :  { %v2124_v54 = vadd.f32 %v2123_v51, %v2051_v53 }
0x13df   :  { %v2901_v55 = vpop.f32.mrf.mxu1 }
0x13e0   :  { %v2127_v57 = vadd.f32 %v3711_v56, %v2124_v54 }
0x13e2   :  { %3058 = vtanh.f32 %v2127_v57  ;;  %v2555_v6 = vmul.f32 -1.442695, %v2127_v57 }
0x13e5   :  { %v2239_v1 = vpop.f32.mrf.mxu1 }
0x13e6   :  { %v2243_v59 = vadd.f32 %v2556_v58, %v2239_v1 }
0x13e7   :  { %v2923_v60 = vpop.f32.mrf.mxu1 }
0x13e8   :  { %3060 = vtanh.f32 %v2243_v59  ;;  %v2558_v7 = vmul.f32 -1.442695, %v2243_v59 }
0x13e9   :  { %3062 = vpow2.f32 %v2555_v6 }
0x13ea   :  { %3064 = vpow2.f32 %v2558_v7 }
0x13ef   :  { %v3059_v61 = vpop.eup %3058 }
0x13f0   :  { %2142 = vrot.lane.b32.xlu0 %v3059_v61, %s3141_s7 }
0x13f4   :  { %2137 = vrot.lane.b32.xlu0 %v2128_v62, %s3141_s7 }
0x13f5   :  { %v3061_v63 = vpop.eup %3060 }
0x13f6   :  { %2258 = vrot.lane.b32.xlu1 %v3061_v63, %s3141_s7  ;;  %v3063_v8 = vpop.eup %3062 }
0x13f7   :  { %v2132_v9 = vadd.f32 1.0, %v3063_v8  ;;  %v3065_v10 = vpop.eup %3064 }
0x13f8   :  { %2253 = vrot.lane.b32.xlu0 %v2244_v5, %s3141_s7  ;;  %v2248_v11 = vadd.f32 1.0, %v3065_v10 }
0x13f9   :  { %3066 = vrcp.f32 %v2132_v9 }
0x13fa   :  { %3068 = vrcp.f32 %v2248_v11 }
0x1406   :  { %v3067_v0 = vpop.eup %3066 }
0x1407   :  { %v3069_v4 = vpop.eup %3068 }
0x1462   :  { %v2143_v2 = vpop.permute.xlu0 %2142 }
0x1463   :  { %v2145_v3 = vmul.f32 %v3067_v0, %v2143_v2 }
0x1465   :  { %2147 = vrot.lane.b32.xlu1 %v2145_v3, %s3141_s7 }
0x1466   :  { %v2138_v24 = vpop.permute.xlu0 %2137 }
0x1467   :  { %v2140_v25 = vmul.f32 %v3067_v0, %v2138_v24 }
0x1468   :  { %v2259_v22 = vpop.permute.xlu1 %2258 }
0x1469   :  { %v2261_v23 = vmul.f32 %v3069_v4, %v2259_v22 }
0x146a   :  { %v2254_v28 = vpop.permute.xlu0 %2253 }
0x146b   :  { %2263 = vrot.lane.b32.xlu1 %v2261_v23, %s3141_s7  ;;  %v2256_v39 = vmul.f32 %v3069_v4, %v2254_v28 }
0x14d7   :  { %v2148_v26 = vpop.permute.xlu1 %2147 }
0x14d8   :  { %v2150_v27 = vadd.f32 %v2148_v26, %v2140_v25 }
0x14da   :  { %3070 = vtanh.f32 %v2150_v27 }
0x14dd   :  { %v2264_v12 = vpop.permute.xlu1 %2263 }
0x14de   :  { %v2266_v29 = vadd.f32 %v2264_v12, %v2256_v39 }
0x14e0   :  { %3072 = vtanh.f32 %v2266_v29 }
0x14e7   :  { %v3071_v13 = vpop.eup %3070 }
0x14e8   :  { %2153 = vrot.lane.b32.xlu0 %v3071_v13, %s3141_s7 }
0x14ed   :  { %v3073_v14 = vpop.eup %3072 }
0x14ee   :  { %2269 = vrot.lane.b32.xlu1 %v3073_v14, %s3141_s7 }
0x155a   :  { %v2154_v15 = vpop.permute.xlu0 %2153 }
0x155b   :  { %v2156_v16 = vmul.f32 %v3067_v0, %v2154_v15 }
0x155d   :  { %2158 = vrot.lane.b32.xlu0 %v2156_v16, %s3143_s25 }
0x1560   :  { %v2270_v17 = vpop.permute.xlu1 %2269 }
0x1561   :  { %v2272_v18 = vmul.f32 %v3069_v4, %v2270_v17  ;;  %2163 = vrot.lane.b32.xlu0 %v2150_v27, %s3142_s24 }
0x1563   :  { %2274 = vrot.lane.b32.xlu1 %v2272_v18, %s3143_s25 }
0x15cf   :  { %v2159_v19 = vpop.permute.xlu0 %2158 }
0x15d0   :  { %2161 = vst.msk [vmem:[#allocation3] sm:$0x3] %vm28_vm0, %v2159_v19 }
0x15d3   :  { %v2164_v20 = vpop.permute.xlu0 %2163 }
0x15d4   :  { %2166 = vst.msk [vmem:[#allocation5] sm:$0x3] %vm28_vm0, %v2164_v20 }
0x15d5   :  { %v2275_v21 = vpop.permute.xlu1 %2274 }
0x15d6   :  { %2277 = vst.msk [vmem:[#allocation2] sm:$0x3] %vm28_vm0, %v2275_v21  ;;  %2944 = vmatmul.mubr.msk.f32.vlgmr.msra.gmra.mxu1 %vm54_vm2, %v2275_v21 }
0x15d7   :  { %v2283_v30 = vld [vmem:[#allocation3] sm:$0x3] }
0x15d8   :  { %2933 = vmatmul.mubr.msk.f32.vlgmr.msra.gmra.mxu0 %vm54_vm2, %v2283_v30 }
0x15db   :  { %v2430_v31 = vld [vmem:[#allocation5] sm:$0x3] }
0x15dc   :  { %2439 = vrot.lane.b32.xlu0 %v2430_v31, %s3141_s7 }
0x15dd   :  { %v2472_v32 = vld [vmem:[#allocation2] sm:$0x3] }
0x15de   :  { %2473 = vst.msk [vmem:[#allocation6] sm:$0x3] %vm28_vm0, %v2472_v32 }
0x164e   :  { %v2440_v47 = vpop.permute.xlu0 %2439 }
0x1696   :  { %v2425_v33 = vpop.f32.mrf.mxu1 }
0x1698   :  { %v2945_v34 = vpop.f32.mrf.mxu1  ;;  %v2353_v35 = vpop.f32.mrf.mxu0 }
0x1699   :  { %v2426_v36 = vadd.f32 %v2425_v33, %v2353_v35 }
0x169a   :  { %v2934_v37 = vpop.f32.mrf.mxu0 }
0x169b   :  { %v2429_v38 = vadd.f32 %v3711_v56, %v2426_v36 }
0x169d   :  { %3074 = vtanh.f32 %v2429_v38  ;;  %v2561_v41 = vmul.f32 -1.442695, %v2429_v38 }
0x169f   :  { %3076 = vpow2.f32 %v2561_v41 }
0x16aa   :  { %v3075_v40 = vpop.eup %3074 }
0x16ab   :  { %2444 = vrot.lane.b32.xlu1 %v3075_v40, %s3141_s7 }
0x16ac   :  { %v3077_v42 = vpop.eup %3076 }
0x16ad   :  { %v2434_v43 = vadd.f32 1.0, %v3077_v42 }
0x16af   :  { %3078 = vrcp.f32 %v2434_v43 }
0x16bc   :  { %v3079_v44 = vpop.eup %3078 }
0x16bd   :  { %v2442_v48 = vmul.f32 %v3079_v44, %v2440_v47 }
0x171d   :  { %v2445_v45 = vpop.permute.xlu1 %2444 }
0x171e   :  { %v2447_v46 = vmul.f32 %v3079_v44, %v2445_v45 }
0x1720   :  { %2449 = vrot.lane.b32.xlu1 %v2447_v46, %s3141_s7 }
0x1724   :  { %2279 = vrot.lane.b32.xlu1 %v2266_v29, %s3142_s24 }
0x1792   :  { %v2450_v49 = vpop.permute.xlu1 %2449 }
0x1793   :  { %v2452_v50 = vadd.f32 %v2450_v49, %v2442_v48 }
0x1795   :  { %3080 = vtanh.f32 %v2452_v50  ;;  %2465 = vrot.lane.b32.xlu1 %v2452_v50, %s3142_s24  ;;  %s3095_s24 = scalar_lea.vmem %s2500_s4, 64 }
0x1796   :  { %v2280_v51 = vpop.permute.xlu1 %2279  ;;  %p3096_p0 = scmp.ne.s32.totalorder %s2500_s4, %s3095_s24  ;;  %p3101_p2 = scmp.lt.s32.totalorder %s3095_s24, %s3095_s24 }
0x1797   :  { %2282 = vst.msk [vmem:[#allocation4] sm:$0x3] %vm28_vm0, %v2280_v51 }
0x1798   :  { %p3102_p3 = por %p3101_p2, %p3100_p1 }
0x179a   :  { %p3103_p4 = pnand %p3102_p3, %p3096_p0 }
0x179e   :  { %v2474_v52 = vld [vmem:[#allocation4] sm:$0x3] }
0x179f   :  { %2475 = vst.msk [vmem:[#allocation8] sm:$0x3] %vm28_vm0, %v2474_v52 }
0x17a2   :  { %v3081_v53 = vpop.eup %3080 }
0x17a3   :  { %2455 = vrot.lane.b32.xlu0 %v3081_v53, %s3141_s7 }
0x1807   :  { %v2466_v54 = vpop.permute.xlu1 %2465 }
0x1808   :  { %2468 = vst.msk [vmem:[#allocation5] sm:$0x3] %vm28_vm0, %v2466_v54 }
0x180f   :  { %v2479_v55 = vld [vmem:[#allocation5] sm:$0x3] }
0x1810   :  { %2481 = vst.msk [vmem:[#allocation8 + $0x2] sm:$0x3] %vm28_vm0, %v2479_v55 }
0x1815   :  { %v2456_v56 = vpop.permute.xlu0 %2455 }
0x1816   :  { %v2458_v57 = vmul.f32 %v3079_v44, %v2456_v56 }
0x1817   :  { %3106 = shalt.err (!%p3103_p4)
}
0x1818   :  { %s3145_s21 = smov 2   ;;  %2460 = vrot.lane.b32.xlu0 %v2458_v57, %s3143_s25  ;;  %s3146_s26 = smov [#allocation6]  }
0x1819   :  { %2505 = dma.vmem_to_hbm [thread:$0]  %s2500_s4, 64, %s3764_s6, [#allocation9], %s3141_s7, %s3141_s7, %s3145_s21  }
0x181a   :  { %s2487_s27 = sshll.u32 %s3146_s26, 4  ;;  %s2488_s27 = int_to_ptr.vmem [resolvable:$true] %s2487_s27 }
0x181b   :  { %s3115_s28 = scalar_lea.vmem %s2488_s27, 64  ;;  %p3120_p6 = scmp.lt.s32.totalorder %s2488_s27, %s2488_s27 }
0x181c   :  { %p3116_p5 = scmp.ne.s32.totalorder %s2488_s27, %s3115_s28  ;;  %p3121_p7 = scmp.lt.s32.totalorder %s3115_s28, %s3115_s28 }
0x181e   :  { %p3122_p8 = por %p3121_p7, %p3120_p6 }
0x1820   :  { %p3123_p9 = pnand %p3122_p8, %p3116_p5 }
0x188a   :  { %v2461_v58 = vpop.permute.xlu0 %2460 }
0x188b   :  { %2463 = vst.msk [vmem:[#allocation3] sm:$0x3] %vm28_vm0, %v2461_v58 }
0x1892   :  { %v2476_v1 = vld [vmem:[#allocation3] sm:$0x3] }
0x1893   :  { %2478 = vst.msk [vmem:[#allocation6 + $0x2] sm:$0x3] %vm28_vm0, %v2476_v1 }
0x1894   :  { %3126 = shalt.err (!%p3123_p9)
}
0x1895   :  { %2493 = dma.vmem_to_hbm [thread:$0]  %s2488_s27, 64, %s3763_s5, [#allocation7], %s3141_s7, %s3141_s7, %s3145_s21  }
0x1896   :  { %3135 = dma.done.wait [#allocation7], 64  }
0x1897   :  { %3136 = vsyncadd [#allocation7], 4294967232 }
0x1898   :  { %3137 = dma.done.wait [#allocation9], 64  }
0x1899   :  { %3138 = vsyncadd [#allocation9], 4294967232 }
0x189a   :  { %2512 = vsyncpa [#allocation7], 1 }
0x189b   :  { %2513 = vsyncpa [#allocation9], 1 }

</bundles_post_ra>
